<compile_context>
chip_gen: v7x
topology: tpu7x:2x2x1
jax: 0.10.0
libtpu: 0.0.40
codegen_flags: <defaults>
</compile_context>

<pallas_src>
import functools

import jax
import jax.numpy as jnp
import numpy as np
from jax.experimental import pallas as pl
from jax.experimental.pallas import tpu as pltpu


# --------------------------------------------------------------------------
# In-kernel helpers
# --------------------------------------------------------------------------
def _conv_relu(x, w, b, taps):
    """Valid stride-1 conv along axis 0 of x (T_in, C_in) as ONE im2col matmul.

    w is the im2col-reshaped weight (taps*C_in, C_out); b is (1, C_out).
    """
    t_out = x.shape[0] - taps + 1
    cols = [x[k:k + t_out, :] for k in range(taps)]             # static slices
    xcat = jnp.concatenate(cols, axis=1) if taps > 1 else cols[0]
    y = jnp.dot(xcat, w, preferred_element_type=jnp.float32)    # (T_out, C_out)
    return jnp.maximum(y + b, 0.0)                               # bias bcast + ReLU


def _encoder_kernel(ids_ref,                     # SMEM (S, B) int32 (scalar prefetch)
                    emb_ref,                     # VMEM (V, 1, E) f32
                    w1_ref, b1_ref, w2_ref, b2_ref, w3_ref, b3_ref,
                    o_ref,                       # VMEM (1, C3, T3) f32
                    x_buf,                       # scratch VMEM (S, E) f32
                    *, seq_len, taps):
    b = pl.program_id(0)

    # ---- fused "batch.permute(1,0) + embedding" gather into VMEM scratch ----
    for s in range(seq_len):                     # small static unroll
        idx = ids_ref[s, b]                      # scalar from SMEM
        x_buf[pl.ds(s, 1), :] = emb_ref[idx]     # dynamic row gather -> (1, E)

    h = x_buf[...]                               # (S, E) channel-last

    # ---- conv1 / conv2 / conv3 + ReLU, intermediates stay on-chip ----
    h = _conv_relu(h, w1_ref[...], b1_ref[...], taps[0])   # (T1, fc0)
    h = _conv_relu(h, w2_ref[...], b2_ref[...], taps[1])   # (T2, fc1)
    h = _conv_relu(h, w3_ref[...], b3_ref[...], taps[2])   # (T3, fc2)

    # ---- epilogue: channel-first (PyTorch NCHW) written straight from kernel ----
    o_ref[0] = jnp.transpose(h)                  # (fc2, T3)


# --------------------------------------------------------------------------
# ConvolutionEncoder forward (use_batch_norm=False branch).
# --------------------------------------------------------------------------
def convolution_encoder(batch_ids, emb_table, params):
    """batch_ids: (seq_len, B) int32 (PyTorch layout); emb_table: (V, E) f32;
    params: [(w, b)] * 3 with w: (taps, C_in, C_out), b: (1, C_out).
    Returns (B, C_out, H_out, 1) f32, matching the PyTorch module output."""
    S, B = batch_ids.shape
    V, E = emb_table.shape
    taps = tuple(int(w.shape[0]) for (w, _) in params)
    c_last = int(params[-1][0].shape[2])
    t = S
    for k in taps:
        t = t - k + 1                                           # final H_out
    t3 = t

    emb3 = emb_table.reshape(V, 1, E)                           # leading-dim gather layout
    flat = [(w.reshape(-1, w.shape[2]), b) for (w, b) in params]  # im2col weights

    kern = functools.partial(_encoder_kernel, seq_len=S, taps=taps)
    const2 = lambda i, ids: (0, 0)
    const3 = lambda i, ids: (0, 0, 0)

    out = pl.pallas_call(
        kern,
        out_shape=jax.ShapeDtypeStruct((B, c_last, t3), jnp.float32),
        grid_spec=pltpu.PrefetchScalarGridSpec(
            num_scalar_prefetch=1,
            grid=(B,),
            in_specs=[
                pl.BlockSpec((V, 1, E), const3),                # embedding table
                pl.BlockSpec(flat[0][0].shape, const2),         # w1 (fs0*E, fc0)
                pl.BlockSpec(flat[0][1].shape, const2),         # b1
                pl.BlockSpec(flat[1][0].shape, const2),         # w2 (fs1*fc0, fc1)
                pl.BlockSpec(flat[1][1].shape, const2),         # b2
                pl.BlockSpec(flat[2][0].shape, const2),         # w3 (fs2*fc1, fc2)
                pl.BlockSpec(flat[2][1].shape, const2),         # b3
            ],
            out_specs=pl.BlockSpec((1, c_last, t3), lambda i, ids: (i, 0, 0)),
            scratch_shapes=[pltpu.VMEM((S, E), jnp.float32)],
        ),
        compiler_params=pltpu.CompilerParams(
            dimension_semantics=("parallel",)),
    )(batch_ids, emb3,
      flat[0][0], flat[0][1], flat[1][0], flat[1][1], flat[2][0], flat[2][1])

    # PyTorch NCHW output (B, C_out, H_out, 1): trailing unit dim is a free reshape.
    return out[..., None]
    # TODO(synk): BatchNorm2d branch (use_batch_norm=True) not implemented; args set it False.


# --------------------------------------------------------------------------
# Pure-JAX NCHW reference (mirrors the PyTorch module exactly).
# --------------------------------------------------------------------------
def reference_forward(batch_ids, emb_table, torch_params):
    h = emb_table[batch_ids.T][:, None, :, :]          # (B, 1, S, E) NCHW
    for (w, b) in torch_params:                        # w: (O, I, kh, kw) OIHW
        h = jax.lax.conv_general_dilated(
            h, w, window_strides=(1, 1), padding="VALID",
            dimension_numbers=("NCHW", "OIHW", "NCHW"))
        h = jnp.maximum(h + b[None, :, None, None], 0.0)
    return h


if __name__ == "__main__":
    # ---- args (synthetic, deterministic) ----
    B, S, E = 2, 32, 32                # batch, seq_len, embed_dim
    vocab = 40
    filter_counts = [8, 16, 16]
    filter_sizes = [3, 4, 5]
    # strides = [1, 1, 1]  (stride-1 convolutions)

    key = jax.random.PRNGKey(0)
    k_ids, k_emb, *k_w = jax.random.split(key, 8)

    batch_ids = jax.random.randint(k_ids, (S, B), 0, vocab, dtype=jnp.int32)
    emb_table = jax.random.normal(k_emb, (vocab, E), dtype=jnp.float32) * 0.1

    def init_conv(kw, kb, c_in, c_out, taps):
        # kernel layout (taps, C_in, C_out); PyTorch-like uniform init
        bound = 1.0 / np.sqrt(c_in * taps)
        w = jax.random.uniform(kw, (taps, c_in, c_out), jnp.float32, -bound, bound)
        b = jax.random.uniform(kb, (1, c_out), jnp.float32, -bound, bound)
        return w, b

    w1, b1 = init_conv(k_w[0], k_w[1], E,                filter_counts[0], filter_sizes[0])
    w2, b2 = init_conv(k_w[2], k_w[3], filter_counts[0], filter_counts[1], filter_sizes[1])
    w3, b3 = init_conv(k_w[4], k_w[5], filter_counts[1], filter_counts[2], filter_sizes[2])
    params = [(w1, b1), (w2, b2), (w3, b3)]

    # equivalent PyTorch OIHW weights for the reference check
    torch_params = [
        (jnp.transpose(w1, (2, 0, 1))[:, None, :, :], b1[0]),   # (fc0, 1, fs0, E)
        (jnp.transpose(w2, (2, 1, 0))[:, :, :, None], b2[0]),   # (fc1, fc0, fs1, 1)
        (jnp.transpose(w3, (2, 1, 0))[:, :, :, None], b3[0]),   # (fc2, fc1, fs2, 1)
    ]

    out = jax.block_until_ready(convolution_encoder(batch_ids, emb_table, params))
    ref = jax.block_until_ready(reference_forward(batch_ids, emb_table, torch_params))

    assert out.shape == ref.shape, (out.shape, ref.shape)
    np.testing.assert_allclose(np.asarray(out), np.asarray(ref),
                               rtol=1e-4, atol=1e-4)
    print("KERNEL_OK")
</pallas_src>

<mosaic_0001>
module attributes {stable_mosaic.version = 11 : i64} {
  func.func @_encoder_kernel(%arg0: i32, %arg1: memref<32x2xi32, #tpu.memory_space<smem>>, %arg2: memref<40x1x32xf32, #tpu.memory_space<vmem>>, %arg3: memref<96x8xf32, #tpu.memory_space<vmem>>, %arg4: memref<1x8xf32, #tpu.memory_space<vmem>>, %arg5: memref<32x16xf32, #tpu.memory_space<vmem>>, %arg6: memref<1x16xf32, #tpu.memory_space<vmem>>, %arg7: memref<80x16xf32, #tpu.memory_space<vmem>>, %arg8: memref<1x16xf32, #tpu.memory_space<vmem>>, %arg9: memref<1x16x23xf32, #tpu.memory_space<vmem>>, %arg10: memref<32x32xf32, #tpu.memory_space<vmem>>) attributes {dimension_semantics = [#tpu.dimension_semantics<parallel>], iteration_bounds = array<i64: 2>, scalar_prefetch = 1 : i64, scratch_operands = 1 : i64, tpu.core_type = #tpu.core_type<tc>, window_params = [{pipeline_mode = #tpu.pipeline_mode<synchronous>, transform_indices = @transform_0, window_bounds = array<i64: 40, 1, 32>}, {pipeline_mode = #tpu.pipeline_mode<synchronous>, transform_indices = @transform_1, window_bounds = array<i64: 96, 8>}, {pipeline_mode = #tpu.pipeline_mode<synchronous>, transform_indices = @transform_2, window_bounds = array<i64: 1, 8>}, {pipeline_mode = #tpu.pipeline_mode<synchronous>, transform_indices = @transform_3, window_bounds = array<i64: 32, 16>}, {pipeline_mode = #tpu.pipeline_mode<synchronous>, transform_indices = @transform_4, window_bounds = array<i64: 1, 16>}, {pipeline_mode = #tpu.pipeline_mode<synchronous>, transform_indices = @transform_5, window_bounds = array<i64: 80, 16>}, {pipeline_mode = #tpu.pipeline_mode<synchronous>, transform_indices = @transform_6, window_bounds = array<i64: 1, 16>}, {transform_indices = @transform_7, window_bounds = array<i64: 1, 16, 23>}]} {
    %c0 = arith.constant 0 : index
    %0 = arith.index_cast %arg0 : i32 to index
    %1 = memref.load %arg1[%c0, %0] : memref<32x2xi32, #tpu.memory_space<smem>>
    %2 = arith.index_cast %1 : i32 to index
    %c0_0 = arith.constant 0 : index
    %c0_1 = arith.constant 0 : index
    %3 = vector.load %arg2[%2, %c0_0, %c0_1] : memref<40x1x32xf32, #tpu.memory_space<vmem>>, vector<1x1x32xf32>
    %4 = vector.shape_cast %3 : vector<1x1x32xf32> to vector<1x32xf32>
    %c0_2 = arith.constant 0 : index
    %c0_3 = arith.constant 0 : index
    %5 = vector.load %arg10[%c0_2, %c0_3] : memref<32x32xf32, #tpu.memory_space<vmem>>, vector<1x32xf32>
    tpu.vector_store %arg10[%c0_2, %c0_3], %4 {strides = array<i32>} : memref<32x32xf32, #tpu.memory_space<vmem>>, vector<1x32xf32>,
    %c1 = arith.constant 1 : index
    %6 = arith.index_cast %arg0 : i32 to index
    %7 = memref.load %arg1[%c1, %6] : memref<32x2xi32, #tpu.memory_space<smem>>
    %8 = arith.index_cast %7 : i32 to index
    %c0_4 = arith.constant 0 : index
    %c0_5 = arith.constant 0 : index
    %9 = vector.load %arg2[%8, %c0_4, %c0_5] : memref<40x1x32xf32, #tpu.memory_space<vmem>>, vector<1x1x32xf32>
    %10 = vector.shape_cast %9 : vector<1x1x32xf32> to vector<1x32xf32>
    %c1_6 = arith.constant 1 : index
    %c0_7 = arith.constant 0 : index
    %11 = vector.load %arg10[%c1_6, %c0_7] : memref<32x32xf32, #tpu.memory_space<vmem>>, vector<1x32xf32>
    tpu.vector_store %arg10[%c1_6, %c0_7], %10 {strides = array<i32>} : memref<32x32xf32, #tpu.memory_space<vmem>>, vector<1x32xf32>,
    %c2 = arith.constant 2 : index
    %12 = arith.index_cast %arg0 : i32 to index
    %13 = memref.load %arg1[%c2, %12] : memref<32x2xi32, #tpu.memory_space<smem>>
    %14 = arith.index_cast %13 : i32 to index
    %c0_8 = arith.constant 0 : index
    %c0_9 = arith.constant 0 : index
    %15 = vector.load %arg2[%14, %c0_8, %c0_9] : memref<40x1x32xf32, #tpu.memory_space<vmem>>, vector<1x1x32xf32>
    %16 = vector.shape_cast %15 : vector<1x1x32xf32> to vector<1x32xf32>
    %c2_10 = arith.constant 2 : index
    %c0_11 = arith.constant 0 : index
    %17 = vector.load %arg10[%c2_10, %c0_11] : memref<32x32xf32, #tpu.memory_space<vmem>>, vector<1x32xf32>
    tpu.vector_store %arg10[%c2_10, %c0_11], %16 {strides = array<i32>} : memref<32x32xf32, #tpu.memory_space<vmem>>, vector<1x32xf32>,
    %c3 = arith.constant 3 : index
    %18 = arith.index_cast %arg0 : i32 to index
    %19 = memref.load %arg1[%c3, %18] : memref<32x2xi32, #tpu.memory_space<smem>>
    %20 = arith.index_cast %19 : i32 to index
    %c0_12 = arith.constant 0 : index
    %c0_13 = arith.constant 0 : index
    %21 = vector.load %arg2[%20, %c0_12, %c0_13] : memref<40x1x32xf32, #tpu.memory_space<vmem>>, vector<1x1x32xf32>
    %22 = vector.shape_cast %21 : vector<1x1x32xf32> to vector<1x32xf32>
    %c3_14 = arith.constant 3 : index
    %c0_15 = arith.constant 0 : index
    %23 = vector.load %arg10[%c3_14, %c0_15] : memref<32x32xf32, #tpu.memory_space<vmem>>, vector<1x32xf32>
    tpu.vector_store %arg10[%c3_14, %c0_15], %22 {strides = array<i32>} : memref<32x32xf32, #tpu.memory_space<vmem>>, vector<1x32xf32>,
    %c4 = arith.constant 4 : index
    %24 = arith.index_cast %arg0 : i32 to index
    %25 = memref.load %arg1[%c4, %24] : memref<32x2xi32, #tpu.memory_space<smem>>
    %26 = arith.index_cast %25 : i32 to index
    %c0_16 = arith.constant 0 : index
    %c0_17 = arith.constant 0 : index
    %27 = vector.load %arg2[%26, %c0_16, %c0_17] : memref<40x1x32xf32, #tpu.memory_space<vmem>>, vector<1x1x32xf32>
    %28 = vector.shape_cast %27 : vector<1x1x32xf32> to vector<1x32xf32>
    %c4_18 = arith.constant 4 : index
    %c0_19 = arith.constant 0 : index
    %29 = vector.load %arg10[%c4_18, %c0_19] : memref<32x32xf32, #tpu.memory_space<vmem>>, vector<1x32xf32>
    tpu.vector_store %arg10[%c4_18, %c0_19], %28 {strides = array<i32>} : memref<32x32xf32, #tpu.memory_space<vmem>>, vector<1x32xf32>,
    %c5 = arith.constant 5 : index
    %30 = arith.index_cast %arg0 : i32 to index
    %31 = memref.load %arg1[%c5, %30] : memref<32x2xi32, #tpu.memory_space<smem>>
    %32 = arith.index_cast %31 : i32 to index
    %c0_20 = arith.constant 0 : index
    %c0_21 = arith.constant 0 : index
    %33 = vector.load %arg2[%32, %c0_20, %c0_21] : memref<40x1x32xf32, #tpu.memory_space<vmem>>, vector<1x1x32xf32>
    %34 = vector.shape_cast %33 : vector<1x1x32xf32> to vector<1x32xf32>
    %c5_22 = arith.constant 5 : index
    %c0_23 = arith.constant 0 : index
    %35 = vector.load %arg10[%c5_22, %c0_23] : memref<32x32xf32, #tpu.memory_space<vmem>>, vector<1x32xf32>
    tpu.vector_store %arg10[%c5_22, %c0_23], %34 {strides = array<i32>} : memref<32x32xf32, #tpu.memory_space<vmem>>, vector<1x32xf32>,
    %c6 = arith.constant 6 : index
    %36 = arith.index_cast %arg0 : i32 to index
    %37 = memref.load %arg1[%c6, %36] : memref<32x2xi32, #tpu.memory_space<smem>>
    %38 = arith.index_cast %37 : i32 to index
    %c0_24 = arith.constant 0 : index
    %c0_25 = arith.constant 0 : index
    %39 = vector.load %arg2[%38, %c0_24, %c0_25] : memref<40x1x32xf32, #tpu.memory_space<vmem>>, vector<1x1x32xf32>
    %40 = vector.shape_cast %39 : vector<1x1x32xf32> to vector<1x32xf32>
    %c6_26 = arith.constant 6 : index
    %c0_27 = arith.constant 0 : index
    %41 = vector.load %arg10[%c6_26, %c0_27] : memref<32x32xf32, #tpu.memory_space<vmem>>, vector<1x32xf32>
    tpu.vector_store %arg10[%c6_26, %c0_27], %40 {strides = array<i32>} : memref<32x32xf32, #tpu.memory_space<vmem>>, vector<1x32xf32>,
    %c7 = arith.constant 7 : index
    %42 = arith.index_cast %arg0 : i32 to index
    %43 = memref.load %arg1[%c7, %42] : memref<32x2xi32, #tpu.memory_space<smem>>
    %44 = arith.index_cast %43 : i32 to index
    %c0_28 = arith.constant 0 : index
    %c0_29 = arith.constant 0 : index
    %45 = vector.load %arg2[%44, %c0_28, %c0_29] : memref<40x1x32xf32, #tpu.memory_space<vmem>>, vector<1x1x32xf32>
    %46 = vector.shape_cast %45 : vector<1x1x32xf32> to vector<1x32xf32>
    %c7_30 = arith.constant 7 : index
    %c0_31 = arith.constant 0 : index
    %47 = vector.load %arg10[%c7_30, %c0_31] : memref<32x32xf32, #tpu.memory_space<vmem>>, vector<1x32xf32>
    tpu.vector_store %arg10[%c7_30, %c0_31], %46 {strides = array<i32>} : memref<32x32xf32, #tpu.memory_space<vmem>>, vector<1x32xf32>,
    %c8 = arith.constant 8 : index
    %48 = arith.index_cast %arg0 : i32 to index
    %49 = memref.load %arg1[%c8, %48] : memref<32x2xi32, #tpu.memory_space<smem>>
    %50 = arith.index_cast %49 : i32 to index
    %c0_32 = arith.constant 0 : index
    %c0_33 = arith.constant 0 : index
    %51 = vector.load %arg2[%50, %c0_32, %c0_33] : memref<40x1x32xf32, #tpu.memory_space<vmem>>, vector<1x1x32xf32>
    %52 = vector.shape_cast %51 : vector<1x1x32xf32> to vector<1x32xf32>
    %c8_34 = arith.constant 8 : index
    %c0_35 = arith.constant 0 : index
    %53 = vector.load %arg10[%c8_34, %c0_35] : memref<32x32xf32, #tpu.memory_space<vmem>>, vector<1x32xf32>
    tpu.vector_store %arg10[%c8_34, %c0_35], %52 {strides = array<i32>} : memref<32x32xf32, #tpu.memory_space<vmem>>, vector<1x32xf32>,
    %c9 = arith.constant 9 : index
    %54 = arith.index_cast %arg0 : i32 to index
    %55 = memref.load %arg1[%c9, %54] : memref<32x2xi32, #tpu.memory_space<smem>>
    %56 = arith.index_cast %55 : i32 to index
    %c0_36 = arith.constant 0 : index
    %c0_37 = arith.constant 0 : index
    %57 = vector.load %arg2[%56, %c0_36, %c0_37] : memref<40x1x32xf32, #tpu.memory_space<vmem>>, vector<1x1x32xf32>
    %58 = vector.shape_cast %57 : vector<1x1x32xf32> to vector<1x32xf32>
    %c9_38 = arith.constant 9 : index
    %c0_39 = arith.constant 0 : index
    %59 = vector.load %arg10[%c9_38, %c0_39] : memref<32x32xf32, #tpu.memory_space<vmem>>, vector<1x32xf32>
    tpu.vector_store %arg10[%c9_38, %c0_39], %58 {strides = array<i32>} : memref<32x32xf32, #tpu.memory_space<vmem>>, vector<1x32xf32>,
    %c10 = arith.constant 10 : index
    %60 = arith.index_cast %arg0 : i32 to index
    %61 = memref.load %arg1[%c10, %60] : memref<32x2xi32, #tpu.memory_space<smem>>
    %62 = arith.index_cast %61 : i32 to index
    %c0_40 = arith.constant 0 : index
    %c0_41 = arith.constant 0 : index
    %63 = vector.load %arg2[%62, %c0_40, %c0_41] : memref<40x1x32xf32, #tpu.memory_space<vmem>>, vector<1x1x32xf32>
    %64 = vector.shape_cast %63 : vector<1x1x32xf32> to vector<1x32xf32>
    %c10_42 = arith.constant 10 : index
    %c0_43 = arith.constant 0 : index
    %65 = vector.load %arg10[%c10_42, %c0_43] : memref<32x32xf32, #tpu.memory_space<vmem>>, vector<1x32xf32>
    tpu.vector_store %arg10[%c10_42, %c0_43], %64 {strides = array<i32>} : memref<32x32xf32, #tpu.memory_space<vmem>>, vector<1x32xf32>,
    %c11 = arith.constant 11 : index
    %66 = arith.index_cast %arg0 : i32 to index
    %67 = memref.load %arg1[%c11, %66] : memref<32x2xi32, #tpu.memory_space<smem>>
    %68 = arith.index_cast %67 : i32 to index
    %c0_44 = arith.constant 0 : index
    %c0_45 = arith.constant 0 : index
    %69 = vector.load %arg2[%68, %c0_44, %c0_45] : memref<40x1x32xf32, #tpu.memory_space<vmem>>, vector<1x1x32xf32>
    %70 = vector.shape_cast %69 : vector<1x1x32xf32> to vector<1x32xf32>
    %c11_46 = arith.constant 11 : index
    %c0_47 = arith.constant 0 : index
    %71 = vector.load %arg10[%c11_46, %c0_47] : memref<32x32xf32, #tpu.memory_space<vmem>>, vector<1x32xf32>
    tpu.vector_store %arg10[%c11_46, %c0_47], %70 {strides = array<i32>} : memref<32x32xf32, #tpu.memory_space<vmem>>, vector<1x32xf32>,
    %c12 = arith.constant 12 : index
    %72 = arith.index_cast %arg0 : i32 to index
    %73 = memref.load %arg1[%c12, %72] : memref<32x2xi32, #tpu.memory_space<smem>>
    %74 = arith.index_cast %73 : i32 to index
    %c0_48 = arith.constant 0 : index
    %c0_49 = arith.constant 0 : index
    %75 = vector.load %arg2[%74, %c0_48, %c0_49] : memref<40x1x32xf32, #tpu.memory_space<vmem>>, vector<1x1x32xf32>
    %76 = vector.shape_cast %75 : vector<1x1x32xf32> to vector<1x32xf32>
    %c12_50 = arith.constant 12 : index
    %c0_51 = arith.constant 0 : index
    %77 = vector.load %arg10[%c12_50, %c0_51] : memref<32x32xf32, #tpu.memory_space<vmem>>, vector<1x32xf32>
    tpu.vector_store %arg10[%c12_50, %c0_51], %76 {strides = array<i32>} : memref<32x32xf32, #tpu.memory_space<vmem>>, vector<1x32xf32>,
    %c13 = arith.constant 13 : index
    %78 = arith.index_cast %arg0 : i32 to index
    %79 = memref.load %arg1[%c13, %78] : memref<32x2xi32, #tpu.memory_space<smem>>
    %80 = arith.index_cast %79 : i32 to index
    %c0_52 = arith.constant 0 : index
    %c0_53 = arith.constant 0 : index
    %81 = vector.load %arg2[%80, %c0_52, %c0_53] : memref<40x1x32xf32, #tpu.memory_space<vmem>>, vector<1x1x32xf32>
    %82 = vector.shape_cast %81 : vector<1x1x32xf32> to vector<1x32xf32>
    %c13_54 = arith.constant 13 : index
    %c0_55 = arith.constant 0 : index
    %83 = vector.load %arg10[%c13_54, %c0_55] : memref<32x32xf32, #tpu.memory_space<vmem>>, vector<1x32xf32>
    tpu.vector_store %arg10[%c13_54, %c0_55], %82 {strides = array<i32>} : memref<32x32xf32, #tpu.memory_space<vmem>>, vector<1x32xf32>,
    %c14 = arith.constant 14 : index
    %84 = arith.index_cast %arg0 : i32 to index
    %85 = memref.load %arg1[%c14, %84] : memref<32x2xi32, #tpu.memory_space<smem>>
    %86 = arith.index_cast %85 : i32 to index
    %c0_56 = arith.constant 0 : index
    %c0_57 = arith.constant 0 : index
    %87 = vector.load %arg2[%86, %c0_56, %c0_57] : memref<40x1x32xf32, #tpu.memory_space<vmem>>, vector<1x1x32xf32>
    %88 = vector.shape_cast %87 : vector<1x1x32xf32> to vector<1x32xf32>
    %c14_58 = arith.constant 14 : index
    %c0_59 = arith.constant 0 : index
    %89 = vector.load %arg10[%c14_58, %c0_59] : memref<32x32xf32, #tpu.memory_space<vmem>>, vector<1x32xf32>
    tpu.vector_store %arg10[%c14_58, %c0_59], %88 {strides = array<i32>} : memref<32x32xf32, #tpu.memory_space<vmem>>, vector<1x32xf32>,
    %c15 = arith.constant 15 : index
    %90 = arith.index_cast %arg0 : i32 to index
    %91 = memref.load %arg1[%c15, %90] : memref<32x2xi32, #tpu.memory_space<smem>>
    %92 = arith.index_cast %91 : i32 to index
    %c0_60 = arith.constant 0 : index
    %c0_61 = arith.constant 0 : index
    %93 = vector.load %arg2[%92, %c0_60, %c0_61] : memref<40x1x32xf32, #tpu.memory_space<vmem>>, vector<1x1x32xf32>
    %94 = vector.shape_cast %93 : vector<1x1x32xf32> to vector<1x32xf32>
    %c15_62 = arith.constant 15 : index
    %c0_63 = arith.constant 0 : index
    %95 = vector.load %arg10[%c15_62, %c0_63] : memref<32x32xf32, #tpu.memory_space<vmem>>, vector<1x32xf32>
    tpu.vector_store %arg10[%c15_62, %c0_63], %94 {strides = array<i32>} : memref<32x32xf32, #tpu.memory_space<vmem>>, vector<1x32xf32>,
    %c16 = arith.constant 16 : index
    %96 = arith.index_cast %arg0 : i32 to index
    %97 = memref.load %arg1[%c16, %96] : memref<32x2xi32, #tpu.memory_space<smem>>
    %98 = arith.index_cast %97 : i32 to index
    %c0_64 = arith.constant 0 : index
    %c0_65 = arith.constant 0 : index
    %99 = vector.load %arg2[%98, %c0_64, %c0_65] : memref<40x1x32xf32, #tpu.memory_space<vmem>>, vector<1x1x32xf32>
    %100 = vector.shape_cast %99 : vector<1x1x32xf32> to vector<1x32xf32>
    %c16_66 = arith.constant 16 : index
    %c0_67 = arith.constant 0 : index
    %101 = vector.load %arg10[%c16_66, %c0_67] : memref<32x32xf32, #tpu.memory_space<vmem>>, vector<1x32xf32>
    tpu.vector_store %arg10[%c16_66, %c0_67], %100 {strides = array<i32>} : memref<32x32xf32, #tpu.memory_space<vmem>>, vector<1x32xf32>,
    %c17 = arith.constant 17 : index
    %102 = arith.index_cast %arg0 : i32 to index
    %103 = memref.load %arg1[%c17, %102] : memref<32x2xi32, #tpu.memory_space<smem>>
    %104 = arith.index_cast %103 : i32 to index
    %c0_68 = arith.constant 0 : index
    %c0_69 = arith.constant 0 : index
    %105 = vector.load %arg2[%104, %c0_68, %c0_69] : memref<40x1x32xf32, #tpu.memory_space<vmem>>, vector<1x1x32xf32>
    %106 = vector.shape_cast %105 : vector<1x1x32xf32> to vector<1x32xf32>
    %c17_70 = arith.constant 17 : index
    %c0_71 = arith.constant 0 : index
    %107 = vector.load %arg10[%c17_70, %c0_71] : memref<32x32xf32, #tpu.memory_space<vmem>>, vector<1x32xf32>
    tpu.vector_store %arg10[%c17_70, %c0_71], %106 {strides = array<i32>} : memref<32x32xf32, #tpu.memory_space<vmem>>, vector<1x32xf32>,
    %c18 = arith.constant 18 : index
    %108 = arith.index_cast %arg0 : i32 to index
    %109 = memref.load %arg1[%c18, %108] : memref<32x2xi32, #tpu.memory_space<smem>>
    %110 = arith.index_cast %109 : i32 to index
    %c0_72 = arith.constant 0 : index
    %c0_73 = arith.constant 0 : index
    %111 = vector.load %arg2[%110, %c0_72, %c0_73] : memref<40x1x32xf32, #tpu.memory_space<vmem>>, vector<1x1x32xf32>
    %112 = vector.shape_cast %111 : vector<1x1x32xf32> to vector<1x32xf32>
    %c18_74 = arith.constant 18 : index
    %c0_75 = arith.constant 0 : index
    %113 = vector.load %arg10[%c18_74, %c0_75] : memref<32x32xf32, #tpu.memory_space<vmem>>, vector<1x32xf32>
    tpu.vector_store %arg10[%c18_74, %c0_75], %112 {strides = array<i32>} : memref<32x32xf32, #tpu.memory_space<vmem>>, vector<1x32xf32>,
    %c19 = arith.constant 19 : index
    %114 = arith.index_cast %arg0 : i32 to index
    %115 = memref.load %arg1[%c19, %114] : memref<32x2xi32, #tpu.memory_space<smem>>
    %116 = arith.index_cast %115 : i32 to index
    %c0_76 = arith.constant 0 : index
    %c0_77 = arith.constant 0 : index
    %117 = vector.load %arg2[%116, %c0_76, %c0_77] : memref<40x1x32xf32, #tpu.memory_space<vmem>>, vector<1x1x32xf32>
    %118 = vector.shape_cast %117 : vector<1x1x32xf32> to vector<1x32xf32>
    %c19_78 = arith.constant 19 : index
    %c0_79 = arith.constant 0 : index
    %119 = vector.load %arg10[%c19_78, %c0_79] : memref<32x32xf32, #tpu.memory_space<vmem>>, vector<1x32xf32>
    tpu.vector_store %arg10[%c19_78, %c0_79], %118 {strides = array<i32>} : memref<32x32xf32, #tpu.memory_space<vmem>>, vector<1x32xf32>,
    %c20 = arith.constant 20 : index
    %120 = arith.index_cast %arg0 : i32 to index
    %121 = memref.load %arg1[%c20, %120] : memref<32x2xi32, #tpu.memory_space<smem>>
    %122 = arith.index_cast %121 : i32 to index
    %c0_80 = arith.constant 0 : index
    %c0_81 = arith.constant 0 : index
    %123 = vector.load %arg2[%122, %c0_80, %c0_81] : memref<40x1x32xf32, #tpu.memory_space<vmem>>, vector<1x1x32xf32>
    %124 = vector.shape_cast %123 : vector<1x1x32xf32> to vector<1x32xf32>
    %c20_82 = arith.constant 20 : index
    %c0_83 = arith.constant 0 : index
    %125 = vector.load %arg10[%c20_82, %c0_83] : memref<32x32xf32, #tpu.memory_space<vmem>>, vector<1x32xf32>
    tpu.vector_store %arg10[%c20_82, %c0_83], %124 {strides = array<i32>} : memref<32x32xf32, #tpu.memory_space<vmem>>, vector<1x32xf32>,
    %c21 = arith.constant 21 : index
    %126 = arith.index_cast %arg0 : i32 to index
    %127 = memref.load %arg1[%c21, %126] : memref<32x2xi32, #tpu.memory_space<smem>>
    %128 = arith.index_cast %127 : i32 to index
    %c0_84 = arith.constant 0 : index
    %c0_85 = arith.constant 0 : index
    %129 = vector.load %arg2[%128, %c0_84, %c0_85] : memref<40x1x32xf32, #tpu.memory_space<vmem>>, vector<1x1x32xf32>
    %130 = vector.shape_cast %129 : vector<1x1x32xf32> to vector<1x32xf32>
    %c21_86 = arith.constant 21 : index
    %c0_87 = arith.constant 0 : index
    %131 = vector.load %arg10[%c21_86, %c0_87] : memref<32x32xf32, #tpu.memory_space<vmem>>, vector<1x32xf32>
    tpu.vector_store %arg10[%c21_86, %c0_87], %130 {strides = array<i32>} : memref<32x32xf32, #tpu.memory_space<vmem>>, vector<1x32xf32>,
    %c22 = arith.constant 22 : index
    %132 = arith.index_cast %arg0 : i32 to index
    %133 = memref.load %arg1[%c22, %132] : memref<32x2xi32, #tpu.memory_space<smem>>
    %134 = arith.index_cast %133 : i32 to index
    %c0_88 = arith.constant 0 : index
    %c0_89 = arith.constant 0 : index
    %135 = vector.load %arg2[%134, %c0_88, %c0_89] : memref<40x1x32xf32, #tpu.memory_space<vmem>>, vector<1x1x32xf32>
    %136 = vector.shape_cast %135 : vector<1x1x32xf32> to vector<1x32xf32>
    %c22_90 = arith.constant 22 : index
    %c0_91 = arith.constant 0 : index
    %137 = vector.load %arg10[%c22_90, %c0_91] : memref<32x32xf32, #tpu.memory_space<vmem>>, vector<1x32xf32>
    tpu.vector_store %arg10[%c22_90, %c0_91], %136 {strides = array<i32>} : memref<32x32xf32, #tpu.memory_space<vmem>>, vector<1x32xf32>,
    %c23 = arith.constant 23 : index
    %138 = arith.index_cast %arg0 : i32 to index
    %139 = memref.load %arg1[%c23, %138] : memref<32x2xi32, #tpu.memory_space<smem>>
    %140 = arith.index_cast %139 : i32 to index
    %c0_92 = arith.constant 0 : index
    %c0_93 = arith.constant 0 : index
    %141 = vector.load %arg2[%140, %c0_92, %c0_93] : memref<40x1x32xf32, #tpu.memory_space<vmem>>, vector<1x1x32xf32>
    %142 = vector.shape_cast %141 : vector<1x1x32xf32> to vector<1x32xf32>
    %c23_94 = arith.constant 23 : index
    %c0_95 = arith.constant 0 : index
    %143 = vector.load %arg10[%c23_94, %c0_95] : memref<32x32xf32, #tpu.memory_space<vmem>>, vector<1x32xf32>
    tpu.vector_store %arg10[%c23_94, %c0_95], %142 {strides = array<i32>} : memref<32x32xf32, #tpu.memory_space<vmem>>, vector<1x32xf32>,
    %c24 = arith.constant 24 : index
    %144 = arith.index_cast %arg0 : i32 to index
    %145 = memref.load %arg1[%c24, %144] : memref<32x2xi32, #tpu.memory_space<smem>>
    %146 = arith.index_cast %145 : i32 to index
    %c0_96 = arith.constant 0 : index
    %c0_97 = arith.constant 0 : index
    %147 = vector.load %arg2[%146, %c0_96, %c0_97] : memref<40x1x32xf32, #tpu.memory_space<vmem>>, vector<1x1x32xf32>
    %148 = vector.shape_cast %147 : vector<1x1x32xf32> to vector<1x32xf32>
    %c24_98 = arith.constant 24 : index
    %c0_99 = arith.constant 0 : index
    %149 = vector.load %arg10[%c24_98, %c0_99] : memref<32x32xf32, #tpu.memory_space<vmem>>, vector<1x32xf32>
    tpu.vector_store %arg10[%c24_98, %c0_99], %148 {strides = array<i32>} : memref<32x32xf32, #tpu.memory_space<vmem>>, vector<1x32xf32>,
    %c25 = arith.constant 25 : index
    %150 = arith.index_cast %arg0 : i32 to index
    %151 = memref.load %arg1[%c25, %150] : memref<32x2xi32, #tpu.memory_space<smem>>
    %152 = arith.index_cast %151 : i32 to index
    %c0_100 = arith.constant 0 : index
    %c0_101 = arith.constant 0 : index
    %153 = vector.load %arg2[%152, %c0_100, %c0_101] : memref<40x1x32xf32, #tpu.memory_space<vmem>>, vector<1x1x32xf32>
    %154 = vector.shape_cast %153 : vector<1x1x32xf32> to vector<1x32xf32>
    %c25_102 = arith.constant 25 : index
    %c0_103 = arith.constant 0 : index
    %155 = vector.load %arg10[%c25_102, %c0_103] : memref<32x32xf32, #tpu.memory_space<vmem>>, vector<1x32xf32>
    tpu.vector_store %arg10[%c25_102, %c0_103], %154 {strides = array<i32>} : memref<32x32xf32, #tpu.memory_space<vmem>>, vector<1x32xf32>,
    %c26 = arith.constant 26 : index
    %156 = arith.index_cast %arg0 : i32 to index
    %157 = memref.load %arg1[%c26, %156] : memref<32x2xi32, #tpu.memory_space<smem>>
    %158 = arith.index_cast %157 : i32 to index
    %c0_104 = arith.constant 0 : index
    %c0_105 = arith.constant 0 : index
    %159 = vector.load %arg2[%158, %c0_104, %c0_105] : memref<40x1x32xf32, #tpu.memory_space<vmem>>, vector<1x1x32xf32>
    %160 = vector.shape_cast %159 : vector<1x1x32xf32> to vector<1x32xf32>
    %c26_106 = arith.constant 26 : index
    %c0_107 = arith.constant 0 : index
    %161 = vector.load %arg10[%c26_106, %c0_107] : memref<32x32xf32, #tpu.memory_space<vmem>>, vector<1x32xf32>
    tpu.vector_store %arg10[%c26_106, %c0_107], %160 {strides = array<i32>} : memref<32x32xf32, #tpu.memory_space<vmem>>, vector<1x32xf32>,
    %c27 = arith.constant 27 : index
    %162 = arith.index_cast %arg0 : i32 to index
    %163 = memref.load %arg1[%c27, %162] : memref<32x2xi32, #tpu.memory_space<smem>>
    %164 = arith.index_cast %163 : i32 to index
    %c0_108 = arith.constant 0 : index
    %c0_109 = arith.constant 0 : index
    %165 = vector.load %arg2[%164, %c0_108, %c0_109] : memref<40x1x32xf32, #tpu.memory_space<vmem>>, vector<1x1x32xf32>
    %166 = vector.shape_cast %165 : vector<1x1x32xf32> to vector<1x32xf32>
    %c27_110 = arith.constant 27 : index
    %c0_111 = arith.constant 0 : index
    %167 = vector.load %arg10[%c27_110, %c0_111] : memref<32x32xf32, #tpu.memory_space<vmem>>, vector<1x32xf32>
    tpu.vector_store %arg10[%c27_110, %c0_111], %166 {strides = array<i32>} : memref<32x32xf32, #tpu.memory_space<vmem>>, vector<1x32xf32>,
    %c28 = arith.constant 28 : index
    %168 = arith.index_cast %arg0 : i32 to index
    %169 = memref.load %arg1[%c28, %168] : memref<32x2xi32, #tpu.memory_space<smem>>
    %170 = arith.index_cast %169 : i32 to index
    %c0_112 = arith.constant 0 : index
    %c0_113 = arith.constant 0 : index
    %171 = vector.load %arg2[%170, %c0_112, %c0_113] : memref<40x1x32xf32, #tpu.memory_space<vmem>>, vector<1x1x32xf32>
    %172 = vector.shape_cast %171 : vector<1x1x32xf32> to vector<1x32xf32>
    %c28_114 = arith.constant 28 : index
    %c0_115 = arith.constant 0 : index
    %173 = vector.load %arg10[%c28_114, %c0_115] : memref<32x32xf32, #tpu.memory_space<vmem>>, vector<1x32xf32>
    tpu.vector_store %arg10[%c28_114, %c0_115], %172 {strides = array<i32>} : memref<32x32xf32, #tpu.memory_space<vmem>>, vector<1x32xf32>,
    %c29 = arith.constant 29 : index
    %174 = arith.index_cast %arg0 : i32 to index
    %175 = memref.load %arg1[%c29, %174] : memref<32x2xi32, #tpu.memory_space<smem>>
    %176 = arith.index_cast %175 : i32 to index
    %c0_116 = arith.constant 0 : index
    %c0_117 = arith.constant 0 : index
    %177 = vector.load %arg2[%176, %c0_116, %c0_117] : memref<40x1x32xf32, #tpu.memory_space<vmem>>, vector<1x1x32xf32>
    %178 = vector.shape_cast %177 : vector<1x1x32xf32> to vector<1x32xf32>
    %c29_118 = arith.constant 29 : index
    %c0_119 = arith.constant 0 : index
    %179 = vector.load %arg10[%c29_118, %c0_119] : memref<32x32xf32, #tpu.memory_space<vmem>>, vector<1x32xf32>
    tpu.vector_store %arg10[%c29_118, %c0_119], %178 {strides = array<i32>} : memref<32x32xf32, #tpu.memory_space<vmem>>, vector<1x32xf32>,
    %c30 = arith.constant 30 : index
    %180 = arith.index_cast %arg0 : i32 to index
    %181 = memref.load %arg1[%c30, %180] : memref<32x2xi32, #tpu.memory_space<smem>>
    %182 = arith.index_cast %181 : i32 to index
    %c0_120 = arith.constant 0 : index
    %c0_121 = arith.constant 0 : index
    %183 = vector.load %arg2[%182, %c0_120, %c0_121] : memref<40x1x32xf32, #tpu.memory_space<vmem>>, vector<1x1x32xf32>
    %184 = vector.shape_cast %183 : vector<1x1x32xf32> to vector<1x32xf32>
    %c30_122 = arith.constant 30 : index
    %c0_123 = arith.constant 0 : index
    %185 = vector.load %arg10[%c30_122, %c0_123] : memref<32x32xf32, #tpu.memory_space<vmem>>, vector<1x32xf32>
    tpu.vector_store %arg10[%c30_122, %c0_123], %184 {strides = array<i32>} : memref<32x32xf32, #tpu.memory_space<vmem>>, vector<1x32xf32>,
    %c31 = arith.constant 31 : index
    %186 = arith.index_cast %arg0 : i32 to index
    %187 = memref.load %arg1[%c31, %186] : memref<32x2xi32, #tpu.memory_space<smem>>
    %188 = arith.index_cast %187 : i32 to index
    %c0_124 = arith.constant 0 : index
    %c0_125 = arith.constant 0 : index
    %189 = vector.load %arg2[%188, %c0_124, %c0_125] : memref<40x1x32xf32, #tpu.memory_space<vmem>>, vector<1x1x32xf32>
    %190 = vector.shape_cast %189 : vector<1x1x32xf32> to vector<1x32xf32>
    %c31_126 = arith.constant 31 : index
    %c0_127 = arith.constant 0 : index
    %191 = vector.load %arg10[%c31_126, %c0_127] : memref<32x32xf32, #tpu.memory_space<vmem>>, vector<1x32xf32>
    tpu.vector_store %arg10[%c31_126, %c0_127], %190 {strides = array<i32>} : memref<32x32xf32, #tpu.memory_space<vmem>>, vector<1x32xf32>,
    %c0_128 = arith.constant 0 : index
    %c0_129 = arith.constant 0 : index
    %192 = vector.load %arg10[%c0_128, %c0_129] : memref<32x32xf32, #tpu.memory_space<vmem>>, vector<32x32xf32>
    %c0_130 = arith.constant 0 : index
    %c0_131 = arith.constant 0 : index
    %193 = vector.load %arg3[%c0_130, %c0_131] : memref<96x8xf32, #tpu.memory_space<vmem>>, vector<96x8xf32>
    %c0_132 = arith.constant 0 : index
    %c0_133 = arith.constant 0 : index
    %194 = vector.load %arg4[%c0_132, %c0_133] : memref<1x8xf32, #tpu.memory_space<vmem>>, vector<1x8xf32>
    %195 = vector.extract_strided_slice %192 {offsets = [0, 0], sizes = [30, 32], strides = [1, 1]} : vector<32x32xf32> to vector<30x32xf32>
    %196 = vector.extract_strided_slice %192 {offsets = [1, 0], sizes = [30, 32], strides = [1, 1]} : vector<32x32xf32> to vector<30x32xf32>
    %197 = vector.extract_strided_slice %192 {offsets = [2, 0], sizes = [30, 32], strides = [1, 1]} : vector<32x32xf32> to vector<30x32xf32>
    %198 = tpu.concatenate %195, %196, %197 in 1 : vector<30x32xf32>, vector<30x32xf32>, vector<30x32xf32> -> vector<30x96xf32>
    %cst = arith.constant dense<0.000000e+00> : vector<30x8xf32>
    %199 = tpu.matmul %198, %193, %cst {dimension_numbers = #tpu.dot_dimension_numbers<[1], [0], [0], [1], [0, 0, 1, 1], [], []>} : vector<30x96xf32>, vector<96x8xf32>, vector<30x8xf32> -> vector<30x8xf32>
    %200 = vector.broadcast %194 : vector<1x8xf32> to vector<30x8xf32>
    %201 = arith.addf %199, %200 : vector<30x8xf32>
    %cst_134 = arith.constant 0.000000e+00 : f32
    %202 = vector.broadcast %cst_134 : f32 to vector<30x8xf32>
    %203 = arith.maximumf %201, %202 : vector<30x8xf32>
    %c0_135 = arith.constant 0 : index
    %c0_136 = arith.constant 0 : index
    %204 = vector.load %arg5[%c0_135, %c0_136] : memref<32x16xf32, #tpu.memory_space<vmem>>, vector<32x16xf32>
    %c0_137 = arith.constant 0 : index
    %c0_138 = arith.constant 0 : index
    %205 = vector.load %arg6[%c0_137, %c0_138] : memref<1x16xf32, #tpu.memory_space<vmem>>, vector<1x16xf32>
    %206 = vector.extract_strided_slice %203 {offsets = [0, 0], sizes = [27, 8], strides = [1, 1]} : vector<30x8xf32> to vector<27x8xf32>
    %207 = vector.extract_strided_slice %203 {offsets = [1, 0], sizes = [27, 8], strides = [1, 1]} : vector<30x8xf32> to vector<27x8xf32>
    %208 = vector.extract_strided_slice %203 {offsets = [2, 0], sizes = [27, 8], strides = [1, 1]} : vector<30x8xf32> to vector<27x8xf32>
    %209 = vector.extract_strided_slice %203 {offsets = [3, 0], sizes = [27, 8], strides = [1, 1]} : vector<30x8xf32> to vector<27x8xf32>
    %210 = tpu.concatenate %206, %207, %208, %209 in 1 : vector<27x8xf32>, vector<27x8xf32>, vector<27x8xf32>, vector<27x8xf32> -> vector<27x32xf32>
    %cst_139 = arith.constant dense<0.000000e+00> : vector<27x16xf32>
    %211 = tpu.matmul %210, %204, %cst_139 {dimension_numbers = #tpu.dot_dimension_numbers<[1], [0], [0], [1], [0, 0, 1, 1], [], []>} : vector<27x32xf32>, vector<32x16xf32>, vector<27x16xf32> -> vector<27x16xf32>
    %212 = vector.broadcast %205 : vector<1x16xf32> to vector<27x16xf32>
    %213 = arith.addf %211, %212 : vector<27x16xf32>
    %cst_140 = arith.constant 0.000000e+00 : f32
    %214 = vector.broadcast %cst_140 : f32 to vector<27x16xf32>
    %215 = arith.maximumf %213, %214 : vector<27x16xf32>
    %c0_141 = arith.constant 0 : index
    %c0_142 = arith.constant 0 : index
    %216 = vector.load %arg7[%c0_141, %c0_142] : memref<80x16xf32, #tpu.memory_space<vmem>>, vector<80x16xf32>
    %c0_143 = arith.constant 0 : index
    %c0_144 = arith.constant 0 : index
    %217 = vector.load %arg8[%c0_143, %c0_144] : memref<1x16xf32, #tpu.memory_space<vmem>>, vector<1x16xf32>
    %218 = vector.extract_strided_slice %215 {offsets = [0, 0], sizes = [23, 16], strides = [1, 1]} : vector<27x16xf32> to vector<23x16xf32>
    %219 = vector.extract_strided_slice %215 {offsets = [1, 0], sizes = [23, 16], strides = [1, 1]} : vector<27x16xf32> to vector<23x16xf32>
    %220 = vector.extract_strided_slice %215 {offsets = [2, 0], sizes = [23, 16], strides = [1, 1]} : vector<27x16xf32> to vector<23x16xf32>
    %221 = vector.extract_strided_slice %215 {offsets = [3, 0], sizes = [23, 16], strides = [1, 1]} : vector<27x16xf32> to vector<23x16xf32>
    %222 = vector.extract_strided_slice %215 {offsets = [4, 0], sizes = [23, 16], strides = [1, 1]} : vector<27x16xf32> to vector<23x16xf32>
    %223 = tpu.concatenate %218, %219, %220, %221, %222 in 1 : vector<23x16xf32>, vector<23x16xf32>, vector<23x16xf32>, vector<23x16xf32>, vector<23x16xf32> -> vector<23x80xf32>
    %cst_145 = arith.constant dense<0.000000e+00> : vector<23x16xf32>
    %224 = tpu.matmul %223, %216, %cst_145 {dimension_numbers = #tpu.dot_dimension_numbers<[1], [0], [0], [1], [0, 0, 1, 1], [], []>} : vector<23x80xf32>, vector<80x16xf32>, vector<23x16xf32> -> vector<23x16xf32>
    %225 = vector.broadcast %217 : vector<1x16xf32> to vector<23x16xf32>
    %226 = arith.addf %224, %225 : vector<23x16xf32>
    %cst_146 = arith.constant 0.000000e+00 : f32
    %227 = vector.broadcast %cst_146 : f32 to vector<23x16xf32>
    %228 = arith.maximumf %226, %227 : vector<23x16xf32>
    %229 = tpu.transpose %228, [1, 0] : vector<23x16xf32> -> vector<16x23xf32>
    %c0_147 = arith.constant 0 : index
    %c0_148 = arith.constant 0 : index
    %c0_149 = arith.constant 0 : index
    %230 = vector.load %arg9[%c0_147, %c0_148, %c0_149] : memref<1x16x23xf32, #tpu.memory_space<vmem>>, vector<1x16x23xf32>
    %231 = vector.shape_cast %230 : vector<1x16x23xf32> to vector<16x23xf32>
    %232 = vector.shape_cast %229 : vector<16x23xf32> to vector<1x16x23xf32>
    tpu.vector_store %arg9[%c0_147, %c0_148, %c0_149], %232 {strides = array<i32>} : memref<1x16x23xf32, #tpu.memory_space<vmem>>, vector<1x16x23xf32>,
    return
  }
  func.func @transform_0(%arg0: i32, %arg1: memref<32x2xi32, #tpu.memory_space<smem>>) -> (i32, i32, i32) {
    %c0_i32 = arith.constant 0 : i32
    %c0_i32_0 = arith.constant 0 : i32
    %c0_i32_1 = arith.constant 0 : i32
    %c0_i32_2 = arith.constant 0 : i32
    return %c0_i32, %c0_i32_0, %c0_i32_1 : i32, i32, i32
  }
  func.func @transform_1(%arg0: i32, %arg1: memref<32x2xi32, #tpu.memory_space<smem>>) -> (i32, i32) {
    %c0_i32 = arith.constant 0 : i32
    %c0_i32_0 = arith.constant 0 : i32
    %c0_i32_1 = arith.constant 0 : i32
    return %c0_i32, %c0_i32_0 : i32, i32
  }
  func.func @transform_2(%arg0: i32, %arg1: memref<32x2xi32, #tpu.memory_space<smem>>) -> (i32, i32) {
    %c0_i32 = arith.constant 0 : i32
    %c0_i32_0 = arith.constant 0 : i32
    %c0_i32_1 = arith.constant 0 : i32
    return %c0_i32, %c0_i32_0 : i32, i32
  }
  func.func @transform_3(%arg0: i32, %arg1: memref<32x2xi32, #tpu.memory_space<smem>>) -> (i32, i32) {
    %c0_i32 = arith.constant 0 : i32
    %c0_i32_0 = arith.constant 0 : i32
    %c0_i32_1 = arith.constant 0 : i32
    return %c0_i32, %c0_i32_0 : i32, i32
  }
  func.func @transform_4(%arg0: i32, %arg1: memref<32x2xi32, #tpu.memory_space<smem>>) -> (i32, i32) {
    %c0_i32 = arith.constant 0 : i32
    %c0_i32_0 = arith.constant 0 : i32
    %c0_i32_1 = arith.constant 0 : i32
    return %c0_i32, %c0_i32_0 : i32, i32
  }
  func.func @transform_5(%arg0: i32, %arg1: memref<32x2xi32, #tpu.memory_space<smem>>) -> (i32, i32) {
    %c0_i32 = arith.constant 0 : i32
    %c0_i32_0 = arith.constant 0 : i32
    %c0_i32_1 = arith.constant 0 : i32
    return %c0_i32, %c0_i32_0 : i32, i32
  }
  func.func @transform_6(%arg0: i32, %arg1: memref<32x2xi32, #tpu.memory_space<smem>>) -> (i32, i32) {
    %c0_i32 = arith.constant 0 : i32
    %c0_i32_0 = arith.constant 0 : i32
    %c0_i32_1 = arith.constant 0 : i32
    return %c0_i32, %c0_i32_0 : i32, i32
  }
  func.func @transform_7(%arg0: i32, %arg1: memref<32x2xi32, #tpu.memory_space<smem>>) -> (i32, i32, i32) {
    %c0_i32 = arith.constant 0 : i32
    %c0_i32_0 = arith.constant 0 : i32
    %c0_i32_1 = arith.constant 0 : i32
    return %arg0, %c0_i32, %c0_i32_0 : i32, i32, i32
  }
}

</mosaic_0001>

<bundles_post_ra>
// kernel: tpu_custom_call.1
= control target key start
LH: loop header
LB: loop body
LE: loop exit
PB: predicated region body
PF: predicated region fallthrough
CT: control target
= control target key end

     0   :  { %s2157_s0 = inlined_call_operand.vmem [shape: s32[32,2], index: 0, kind: input, shape index: {}]   ;;  %s2158_s1 = inlined_call_operand.vmem [shape: f32[40,1,32], index: 1, kind: input, shape index: {}]   ;;  %s2159_s2 = inlined_call_operand.vmem [shape: f32[96,8], index: 2, kind: input, shape index: {}]   ;;  %s2160_s3 = inlined_call_operand.vmem [shape: f32[1,8], index: 3, kind: input, shape index: {}]   ;;  %s2161_s4 = inlined_call_operand.vmem [shape: f32[32,16], index: 4, kind: input, shape index: {}]   ;;  %s2162_s5 = inlined_call_operand.vmem [shape: f32[1,16], index: 5, kind: input, shape index: {}]   ;;  %s2163_s6 = inlined_call_operand.vmem [shape: f32[80,16], index: 6, kind: input, shape index: {}]   ;;  %s2164_s7 = inlined_call_operand.vmem [shape: f32[1,16], index: 7, kind: input, shape index: {}]   ;;  %s2165_s8 = inlined_call_operand.hbm [shape: f32[2,16,23], index: 8, kind: output, shape index: {}]  }
   0x1   :  { %s13_s29 = sshll.u32 %s2157_s0, 4  ;;  %s14_s29 = int_to_ptr.vmem [resolvable:$true] %s13_s29 }
   0x2   :  { %s1503_s30 = scalar_lea.vmem %s14_s29, 512  ;;  %p1508_p1 = scmp.lt.s32.totalorder %s14_s29, %s14_s29 }
   0x3   :  { %p1504_p0 = scmp.ne.s32.totalorder %s14_s29, %s1503_s30  ;;  %p1509_p2 = scmp.lt.s32.totalorder %s1503_s30, %s1503_s30 }
   0x5   :  { %p1510_p3 = por %p1509_p2, %p1508_p1 }
   0x7   :  { %p1511_p4 = pnand %p1510_p3, %p1504_p0 }
   0x9   :  { %1514 = shalt.err (!%p1511_p4)  }
   0xa   :  { %s1581_s9 = smov [#allocation4]  }
   0xb   :  { %16 = dma.vmem_to_smem %s14_s29, 512, %s1581_s9, [#allocation3] }
   0xc   :  { %1559 = dma.done.wait [#allocation3], 512 }
   0xd   :  { %1560 = vsyncadd [#allocation3], 4294966784 }
   0xe   :  { %18 = sfence }
   0xf   :  { %19 = vsyncpa [#allocation6], 0 }
  0x10   :  { %21 = vsyncpa [#allocation6 + $0x1], 0  ;;  %s1641_s10 = smov 0   ;;  %s1643_s11 = smov 0  }
  0x11   :  { %s1645_s0 = smov 0   ;;  %s1647_s12 = smov 0  }
  0x12 LB: > { %2172 = sst [smem:[#allocation9_spill]] %s1567_s10  ;;  %s1662_s13 = sadd.s32 4294967295, %s1579_s12   ;;  %s1579_s12 = sphi %s1647_s12, %s2183_s12   ;;  %s1575_s0 = sphi %s1645_s0, %s2185_s0   ;;  %s1571_s11 = sphi %s1643_s11, %s2187_s11   ;;  %s1567_s10 = sphi %s1641_s10, %s2186_s10  }
  0x13   : > { %2173 = sst [smem:[#allocation10_spill]] %s1575_s0  ;;  %s1179_s14 = sadd.s32 4294967294, %s1579_s12  }
  0x14   : > { %2174 = sst [smem:[#allocation11_spill]] %s1579_s12  ;;  %s1666_s15 = sadd.s32 1, %s1579_s12  }
  0x15   : > { %2175 = sst [smem:[#allocation12_spill]] %s1666_s15  ;;  %s181_s16 = sadd.s32 1, %s1575_s0 }
  0x16   : > { %s178_s17 = ssub.s32 %s1579_s12, %s1666_s15  ;;  %p191_p5 = scmp.ne.s32.totalorder %s1575_s0, %s1571_s11 }
  0x17   : > { %p179_p6 = scmp.eq.s32.totalorder %s178_s17, 0  ;;  %p192_p7 = scmp.eq.s32.totalorder %s1662_s13, 1 }
  0x18   : > { %p197_p8 = scmp.ne.s32.totalorder %s1571_s11, %s1567_s10  ;;  %p198_p9 = scmp.eq.s32.totalorder %s1179_s14, 1 }
  0x19   : > { %s1677_s18 = scalar_select %p179_p6, %s1575_s0, %s181_s16  }
  0x1a   : > { %p1679_p10 = por %p192_p7, %p191_p5  ;;  %p1683_p11 = por %p198_p9, %p197_p8 }
  0x1b   : > { %2176 = sst [smem:[#allocation13_spill]] %s1677_s18  ;;  %p1181_p12 = scmp.ge.s32.totalorder %s1579_s12, 1 }
  0x1c   : > { %s2178_s20 = scalar_select %p1683_p11, 1, 0 }
  0x1d   : > { %p237_p13 = scmp.lt.s32.totalorder %s1579_s12, 3 }
  0x1e   : > { %2179 = sst [smem:[#allocation14_spill]] %s2178_s20 }
  0x1f   : > { %p238_p0 = pnand %p1181_p12, %p237_p13 }
  0x20   : > { %s269_s21 = sshra.s32 (!%p238_p0), %s1662_s13, 7  ;;  %s1691_s22 = sand.u32 (!%p238_p0), 127, %s1662_s13  ;;  %v494_v0 = vld [vmem:[%s2159_s2] sm:$0xff] (!%p238_p0)  ;;  %v495_v1 = vld [vmem:[%s2159_s2 + $0x8] sm:$0xff] (!%p238_p0)  ;;  %v496_v2 = vld [vmem:[%s2159_s2 + $0x10] sm:$0xff] (!%p238_p0)  ;;  %vm267_vm0 = vcmask (!%p238_p0), 253952  }
  0x21   : > { %241 = sbr.rel (%p238_p0) target bundleno = 1303 (0x517), region = 48  ;;  %s1696_s25 = sshll.u32 (!%p238_p0), %s269_s21, 7  ;;  %v497_v3 = vld [vmem:[%s2159_s2 + $0x18] sm:$0xff] (!%p238_p0)  ;;  %v1406_v4 = vpack.c.bf16 (!%p238_p0), %v495_v1, %v494_v0  ;;  %v498_v6 = vld [vmem:[%s2159_s2 + $0x20] sm:$0xff] (!%p238_p0)  ;;  %v499_v7 = vld [vmem:[%s2159_s2 + $0x28] sm:$0xff] (!%p238_p0)  ;;  %vm511_vm1 = vcmask (!%p238_p0), 1046528  }
  0x22   : > { %s1280_s14 = sadd.s32 (!%p238_p0), 3072, %s1696_s25  ;;  %s1282_s16 = sadd.s32 (!%p238_p0), 3200, %s1696_s25  ;;  %v1410_v5 = vpack.c.bf16 (!%p238_p0), %v497_v3, %v496_v2  ;;  %v1414_v8 = vpack.c.bf16 (!%p238_p0), %v499_v7, %v498_v6  ;;  %v500_v9 = vld [vmem:[%s2159_s2 + $0x30] sm:$0xff] (!%p238_p0)  ;;  %v501_v10 = vld [vmem:[%s2159_s2 + $0x38] sm:$0xff] (!%p238_p0)  ;;  %v502_v37 = vld [vmem:[%s2159_s2 + $0x40] sm:$0xff] (!%p238_p0)  ;;  %vm531_vm2 = vcmask (!%p238_p0), 1045504  }
  0x23   : > { %s436_s17 = sadd.s32 (!%p238_p0), %s1280_s14, %s1691_s22  ;;  %s443_s21 = sadd.s32 (!%p238_p0), %s1282_s16, %s1691_s22  ;;  %1407 = vmatprep.subr.bf16.mxu0 (!%p238_p0), %v1406_v4  ;;  %v1418_v11 = vpack.c.bf16 (!%p238_p0), %v501_v10, %v500_v9  ;;  %v503_v38 = vld [vmem:[%s2159_s2 + $0x48] sm:$0xff] (!%p238_p0)  ;;  %v504_v55 = vld [vmem:[%s2159_s2 + $0x50] sm:$0xff] (!%p238_p0)  ;;  %v505_v56 = vld [vmem:[%s2159_s2 + $0x58] sm:$0xff] (!%p238_p0)  ;;  %vm551_vm3 = vcmask (!%p238_p0), 261120   ;;  %vm556_vm4 = vcmask (!%p238_p0), 523264   ;;  %vm567_vm5 = vcmask (!%p238_p0), 785408  }
  0x24   : > { %s437_s28 = sld [smem:[#allocation4 + %s436_s17]] (!%p238_p0)  ;;  %s1284_s30 = sadd.s32 (!%p238_p0), 3328, %s1696_s25  ;;  %1409 = vmatpush3.bf16.msra.mxu0 (!%p238_p0), %v1406_v4  ;;  %v1422_v40 = vpack.c.bf16 (!%p238_p0), %v503_v38, %v502_v37  ;;  %v1426_v58 = vpack.c.bf16 (!%p238_p0), %v505_v56, %v504_v55  ;;  %vm716_vm6 = vcmask (!%p238_p0), 1044480   ;;  %vm736_vm7 = vcmask (!%p238_p0), 64512  }
  0x25   : > { %s444_s29 = sld [smem:[#allocation4 + %s443_s21]] (!%p238_p0)  ;;  %s1286_s9 = sadd.s32 (!%p238_p0), 3456, %s1696_s25  ;;  %1411 = vmatprep.subr.bf16.mxu0 (!%p238_p0), %v1410_v5  ;;  %vm741_vm8 = vcmask (!%p238_p0), 130048   ;;  %vm746_vm9 = vcmask (!%p238_p0), 195584   ;;  %vm1588_vm10 = vmmov (!%p238_p0), 0   ;;  %vm919_vm11 = vcmask (!%p238_p0), 1043456  }
  0x26   : > { %s450_s14 = sadd.s32 (!%p238_p0), %s1284_s30, %s1691_s22  ;;  %s457_s16 = sadd.s32 (!%p238_p0), %s1286_s9, %s1691_s22  ;;  %vm942_vm12 = vcmask (!%p238_p0), 392192   ;;  %vm955_vm13 = vcmask (!%p238_p0), 654336   ;;  %vm1080_vm14 = vcmask (!%p238_p0), 187392  }
  0x27   : > { %s451_s23 = sld [smem:[#allocation4 + %s450_s14]] (!%p238_p0)  ;;  %s1288_s17 = sadd.s32 (!%p238_p0), 3584, %s1696_s25 }
  0x28   : > { %s458_s24 = sld [smem:[#allocation4 + %s457_s16]]  ;;  %s1290_s21 = sadd.s32 3712, %s1696_s25  ;;  %1413 = vmatpush3.bf16.msra.mxu0 %v1410_v5 }
  0x29   : > { %s464_s15 = sadd.s32 %s1288_s17, %s1691_s22  ;;  %s471_s30 = sadd.s32 %s1290_s21, %s1691_s22  ;;  %1415 = vmatprep.subr.bf16.mxu0 %v1414_v8 }
  0x2a   : > { %s438_s14 = scalar_lea.vmem %s2158_s1, %s437_s28  ;;  %s465_s18 = sld [smem:[#allocation4 + %s464_s15]] }
  0x2b   : > { %s445_s0 = scalar_lea.vmem %s2158_s1, %s444_s29  ;;  %v439_v12 = vld [vmem:[%s438_s14] sm:$0x1]  ;;  %s472_s26 = sld [smem:[#allocation4 + %s471_s30]] }
  0x2c   : > { %v446_v13 = vld [vmem:[%s445_s0] sm:$0x1]  ;;  %440 = vst.msk [vmem:[#allocation2 + $0x18] sm:$0x1] %vm267_vm0, %v439_v12  ;;  %s1292_s20 = sadd.s32 3840, %s1696_s25  ;;  %s1294_s28 = sadd.s32 3968, %s1696_s25  ;;  %1417 = vmatpush3.bf16.msra.mxu0 %v1414_v8 }
  0x2d   : > { %447 = vst.msk [vmem:[#allocation2 + $0x19] sm:$0x1] %vm267_vm0, %v446_v13  ;;  %s452_s10 = scalar_lea.vmem %s2158_s1, %s451_s23  ;;  %s478_s15 = sadd.s32 %s1292_s20, %s1691_s22  ;;  %1419 = vmatprep.subr.bf16.mxu0 %v1418_v11 }
  0x2e   : > { %s459_s9 = scalar_lea.vmem %s2158_s1, %s458_s24  ;;  %v453_v14 = vld [vmem:[%s452_s10] sm:$0x1]  ;;  %s485_s30 = sadd.s32 %s1294_s28, %s1691_s22 }
  0x2f   : > { %v460_v15 = vld [vmem:[%s459_s9] sm:$0x1]  ;;  %454 = vst.msk [vmem:[#allocation2 + $0x1a] sm:$0x1] %vm267_vm0, %v453_v14  ;;  %s479_s14 = sld [smem:[#allocation4 + %s478_s15]]  ;;  %s1234_s0 = sadd.s32 128, %s1696_s25 }
  0x30   : > { %461 = vst.msk [vmem:[#allocation2 + $0x1b] sm:$0x1] %vm267_vm0, %v460_v15  ;;  %s486_s23 = sld [smem:[#allocation4 + %s485_s30]]  ;;  %s466_s17 = scalar_lea.vmem %s2158_s1, %s465_s18  ;;  %1421 = vmatpush3.bf16.msra.mxu0 %v1418_v11 }
  0x31   : > { %s264_s16 = sld [smem:[#allocation4 + %s1662_s13]]  ;;  %s473_s20 = scalar_lea.vmem %s2158_s1, %s472_s26  ;;  %v467_v16 = vld [vmem:[%s466_s17] sm:$0x1]  ;;  %1423 = vmatprep.subr.bf16.mxu0 %v1422_v40 }
  0x32   : > { %v474_v17 = vld [vmem:[%s473_s20] sm:$0x1]  ;;  %s275_s28 = sadd.s32 %s1234_s0, %s1691_s22  ;;  %s1236_s21 = sadd.s32 256, %s1696_s25  ;;  %468 = vst.msk [vmem:[#allocation2 + $0x1c] sm:$0x1] %vm267_vm0, %v467_v16 }
  0x33   : > { %475 = vst.msk [vmem:[#allocation2 + $0x1d] sm:$0x1] %vm267_vm0, %v474_v17  ;;  %s276_s9 = sld [smem:[#allocation4 + %s275_s28]]  ;;  %s282_s15 = sadd.s32 %s1236_s21, %s1691_s22 }
  0x34   : > { %s283_s18 = sld [smem:[#allocation4 + %s282_s15]]  ;;  %s1238_s30 = sadd.s32 384, %s1696_s25  ;;  %1425 = vmatpush3.bf16.msra.mxu0 %v1422_v40 }
  0x35   : > { %s480_s26 = scalar_lea.vmem %s2158_s1, %s479_s14  ;;  %s289_s12 = sadd.s32 %s1238_s30, %s1691_s22  ;;  %1427 = vmatprep.subr.bf16.mxu0 %v1426_v58 }
  0x36   : > { %s487_s0 = scalar_lea.vmem %s2158_s1, %s486_s23  ;;  %v481_v18 = vld [vmem:[%s480_s26] sm:$0x1]  ;;  %s290_s14 = sld [smem:[#allocation4 + %s289_s12]] }
  0x37   : > { %v488_v19 = vld [vmem:[%s487_s0] sm:$0x1]  ;;  %s265_s28 = scalar_lea.vmem %s2158_s1, %s264_s16  ;;  %482 = vst.msk [vmem:[#allocation2 + $0x1e] sm:$0x1] %vm267_vm0, %v481_v18  ;;  %s1240_s21 = sadd.s32 512, %s1696_s25 }
  0x38   : > { %489 = vst.msk [vmem:[#allocation2 + $0x1f] sm:$0x1] %vm267_vm0, %v488_v19  ;;  %v266_v20 = vld [vmem:[%s265_s28] sm:$0x1]  ;;  %s296_s23 = sadd.s32 %s1240_s21, %s1691_s22  ;;  %s1242_s15 = sadd.s32 640, %s1696_s25  ;;  %1429 = vmatpush3.bf16.msra.mxu0 %v1426_v58 }
  0x39   : > { %268 = vst.msk [vmem:[#allocation2] sm:$0x1] %vm267_vm0, %v266_v20  ;;  %s277_s26 = scalar_lea.vmem %s2158_s1, %s276_s9  ;;  %s297_s16 = sld [smem:[#allocation4 + %s296_s23]]  ;;  %v1214_v20 = vld [vmem:[%s2160_s3] ss:$0 sm:$0xff] }
  0x3a   : > { %v278_v21 = vld [vmem:[%s277_s26] sm:$0x1]  ;;  %s284_s17 = scalar_lea.vmem %s2158_s1, %s283_s18  ;;  %s303_s0 = sadd.s32 %s1242_s15, %s1691_s22 }
  0x3b   : > { %279 = vst.msk [vmem:[#allocation2 + $0x1] sm:$0x1] %vm267_vm0, %v278_v21  ;;  %v285_v22 = vld [vmem:[%s284_s17] sm:$0x1]  ;;  %s304_s12 = sld [smem:[#allocation4 + %s303_s0]]  ;;  %s1244_s29 = sadd.s32 768, %s1696_s25 }
  0x3c   : > { %286 = vst.msk [vmem:[#allocation2 + $0x2] sm:$0x1] %vm267_vm0, %v285_v22  ;;  %s310_s20 = sadd.s32 %s1244_s29, %s1691_s22  ;;  %s1246_s9 = sadd.s32 896, %s1696_s25 }
  0x3d   : > { %s291_s23 = scalar_lea.vmem %s2158_s1, %s290_s14  ;;  %s311_s27 = sld [smem:[#allocation4 + %s310_s20]] }
  0x3e   : > { %v292_v24 = vld [vmem:[%s291_s23] sm:$0x1]  ;;  %s317_s18 = sadd.s32 %s1246_s9, %s1691_s22  ;;  %s1248_s15 = sadd.s32 1024, %s1696_s25 }
  0x3f   : > { %v1796_v23 = vld [vmem:[#allocation2 + $0x18] sm:$0xff]  ;;  %293 = vst.msk [vmem:[#allocation2 + $0x3] sm:$0x1] %vm267_vm0, %v292_v24  ;;  %s298_s30 = scalar_lea.vmem %s2158_s1, %s297_s16  ;;  %s318_s10 = sld [smem:[#allocation4 + %s317_s18]] }
  0x40   : > { %v517_v25 = vrot.slane %v1796_v23, 1  ;;  %v299_v26 = vld [vmem:[%s298_s30] sm:$0x1]  ;;  %s324_s14 = sadd.s32 %s1248_s15, %s1691_s22  ;;  %s1250_s17 = sadd.s32 1152, %s1696_s25  ;;  %v537_v1 = vrot.slane %v1796_v23, 2 }
  0x41   : > { %s1582_s0 = smov 32   ;;  %300 = vst.msk [vmem:[#allocation2 + $0x4] sm:$0x1] %vm267_vm0, %v299_v26  ;;  %s305_s9 = scalar_lea.vmem %s2158_s1, %s304_s12 }
  0x42   : > { %525 = vrot.lane.b32.xlu1 %v517_v25, %s1582_s0  ;;  %s325_s16 = sld [smem:[#allocation4 + %s324_s14]]  ;;  %v306_v27 = vld [vmem:[%s305_s9] sm:$0x1]  ;;  %s331_s28 = sadd.s32 %s1250_s17, %s1691_s22 }
  0x43   : > { %s1252_s21 = sadd.s32 1280, %s1696_s25  ;;  %307 = vst.msk [vmem:[#allocation2 + $0x5] sm:$0x1] %vm267_vm0, %v306_v27  ;;  %s312_s15 = scalar_lea.vmem %s2158_s1, %s311_s27 }
  0x44   : > { %s332_s24 = sld [smem:[#allocation4 + %s331_s28]]  ;;  %v313_v28 = vld [vmem:[%s312_s15] sm:$0x1]  ;;  %s338_s26 = sadd.s32 %s1252_s21, %s1691_s22 }
  0x45   : > { %s1254_s30 = sadd.s32 1408, %s1696_s25  ;;  %314 = vst.msk [vmem:[#allocation2 + $0x6] sm:$0x1] %vm267_vm0, %v313_v28  ;;  %s319_s14 = scalar_lea.vmem %s2158_s1, %s318_s10 }
  0x46   : > { %s339_s17 = sld [smem:[#allocation4 + %s338_s26]]  ;;  %v320_v29 = vld [vmem:[%s319_s14] sm:$0x1]  ;;  %s345_s20 = sadd.s32 %s1254_s30, %s1691_s22 }
  0x47   : > { %s1256_s9 = sadd.s32 1536, %s1696_s25  ;;  %321 = vst.msk [vmem:[#allocation2 + $0x7] sm:$0x1] %vm267_vm0, %v320_v29  ;;  %s346_s21 = sld [smem:[#allocation4 + %s345_s20]] }
  0x48   : > { %s326_s28 = scalar_lea.vmem %s2158_s1, %s325_s16  ;;  %s352_s18 = sadd.s32 %s1256_s9, %s1691_s22 }
  0x49   : > { %v327_v30 = vld [vmem:[%s326_s28] sm:$0x1]  ;;  %s1258_s15 = sadd.s32 1664, %s1696_s25  ;;  %s353_s30 = sld [smem:[#allocation4 + %s352_s18]] }
  0x4a   : > { %328 = vst.msk [vmem:[#allocation2 + $0x8] sm:$0x1] %vm267_vm0, %v327_v30  ;;  %s333_s26 = scalar_lea.vmem %s2158_s1, %s332_s24  ;;  %s359_s29 = sadd.s32 %s1258_s15, %s1691_s22 }
  0x4b   : > { %v334_v31 = vld [vmem:[%s333_s26] sm:$0x1]  ;;  %s1260_s14 = sadd.s32 1792, %s1696_s25  ;;  %s360_s9 = sld [smem:[#allocation4 + %s359_s29]] }
  0x4c   : > { %335 = vst.msk [vmem:[#allocation2 + $0x9] sm:$0x1] %vm267_vm0, %v334_v31  ;;  %s340_s20 = scalar_lea.vmem %s2158_s1, %s339_s17  ;;  %s366_s23 = sadd.s32 %s1260_s14, %s1691_s22 }
  0x4d   : > { %v341_v32 = vld [vmem:[%s340_s20] sm:$0x1]  ;;  %s1262_s28 = sadd.s32 1920, %s1696_s25  ;;  %s347_s15 = scalar_lea.vmem %s2158_s1, %s346_s21 }
  0x4e   : > { %342 = vst.msk [vmem:[#allocation2 + $0xa] sm:$0x1] %vm267_vm0, %v341_v32  ;;  %s367_s10 = sld [smem:[#allocation4 + %s366_s23]]  ;;  %v348_v33 = vld [vmem:[%s347_s15] sm:$0x1]  ;;  %s373_s12 = sadd.s32 %s1262_s28, %s1691_s22  ;;  %v1890_v42 = vld [vmem:[#allocation2] sm:$0xff] }
  0x4f   : > { %349 = vst.msk [vmem:[#allocation2 + $0xb] sm:$0x1] %vm267_vm0, %v348_v33  ;;  %s354_s17 = scalar_lea.vmem %s2158_s1, %s353_s30  ;;  %s374_s29 = sld [smem:[#allocation4 + %s373_s12]]  ;;  %v512_v44 = vrot.slane %v1890_v42, 1  ;;  %v532_v45 = vrot.slane %v1890_v42, 2 }
  0x50   : > { %v355_v34 = vld [vmem:[%s354_s17] sm:$0x1]  ;;  %s1264_s14 = sadd.s32 2048, %s1696_s25  ;;  %s1266_s27 = sadd.s32 2176, %s1696_s25 }
  0x51   : > { %356 = vst.msk [vmem:[#allocation2 + $0xc] sm:$0x1] %vm267_vm0, %v355_v34  ;;  %s361_s23 = scalar_lea.vmem %s2158_s1, %s360_s9  ;;  %s380_s28 = sadd.s32 %s1264_s14, %s1691_s22 }
  0x52   : > { %v362_v35 = vld [vmem:[%s361_s23] sm:$0x1]  ;;  %s381_s24 = sld [smem:[#allocation4 + %s380_s28]]  ;;  %s387_s18 = sadd.s32 %s1266_s27, %s1691_s22 }
  0x53   : > { %363 = vst.msk [vmem:[#allocation2 + $0xd] sm:$0x1] %vm267_vm0, %v362_v35  ;;  %s388_s26 = sld [smem:[#allocation4 + %s387_s18]]  ;;  %s1268_s16 = sadd.s32 2304, %s1696_s25  ;;  %v669_v35 = vld [vmem:[%s2161_s4] sm:$0xff] }
  0x54   : > { %s368_s12 = scalar_lea.vmem %s2158_s1, %s367_s10  ;;  %s1270_s17 = sadd.s32 2432, %s1696_s25 }
  0x55   : > { %v369_v36 = vld [vmem:[%s368_s12] sm:$0x1]  ;;  %s375_s20 = scalar_lea.vmem %s2158_s1, %s374_s29  ;;  %s394_s21 = sadd.s32 %s1268_s16, %s1691_s22 }
  0x56   : > { %370 = vst.msk [vmem:[#allocation2 + $0xe] sm:$0x1] %vm267_vm0, %v369_v36  ;;  %v376_v39 = vld [vmem:[%s375_s20] sm:$0x1]  ;;  %s395_s10 = sld [smem:[#allocation4 + %s394_s21]]  ;;  %s401_s18 = sadd.s32 %s1270_s17, %s1691_s22  ;;  %v670_v36 = vld [vmem:[%s2161_s4 + $0x8] sm:$0xff] }
  0x57   : > { %377 = vst.msk [vmem:[#allocation2 + $0xf] sm:$0x1] %vm267_vm0, %v376_v39  ;;  %s402_s15 = sld [smem:[#allocation4 + %s401_s18]]  ;;  %s1272_s29 = sadd.s32 2560, %s1696_s25  ;;  %v1430_v38 = vpack.c.bf16 %v670_v36, %v669_v35  ;;  %v1219_v36 = vld [vmem:[%s2162_s5] ss:$0 sm:$0xff] }
  0x58   : > { %s382_s9 = scalar_lea.vmem %s2158_s1, %s381_s24  ;;  %s408_s14 = sadd.s32 %s1272_s29, %s1691_s22 }
  0x59   : > { %v383_v41 = vld [vmem:[%s382_s9] sm:$0x1]  ;;  %s389_s21 = scalar_lea.vmem %s2158_s1, %s388_s26  ;;  %s409_s17 = sld [smem:[#allocation4 + %s408_s14]]  ;;  %1431 = vmatprep.subr.bf16.mxu1 %v1430_v38 }
  0x5a   : > { %384 = vst.msk [vmem:[#allocation2 + $0x10] sm:$0x1] %vm267_vm0, %v383_v41  ;;  %v390_v43 = vld [vmem:[%s389_s21] sm:$0x1]  ;;  %s1274_s23 = sadd.s32 2688, %s1696_s25  ;;  %s1276_s28 = sadd.s32 2816, %s1696_s25  ;;  %1433 = vmatpush3.bf16.msra.mxu1 %v1430_v38 }
  0x5b   : > { %391 = vst.msk [vmem:[#allocation2 + $0x11] sm:$0x1] %vm267_vm0, %v390_v43  ;;  %s415_s24 = sadd.s32 %s1274_s23, %s1691_s22  ;;  %s422_s30 = sadd.s32 %s1276_s28, %s1691_s22 }
  0x5c   : > { %s396_s12 = scalar_lea.vmem %s2158_s1, %s395_s10  ;;  %s416_s16 = sld [smem:[#allocation4 + %s415_s24]] }
  0x5d   : > { %v397_v46 = vld [vmem:[%s396_s12] sm:$0x1]  ;;  %s403_s14 = scalar_lea.vmem %s2158_s1, %s402_s15  ;;  %s423_s27 = sld [smem:[#allocation4 + %s422_s30]] }
  0x5e   : > { %v491_v47 = vld [vmem:[#allocation2 + $0x8] sm:$0xff]  ;;  %398 = vst.msk [vmem:[#allocation2 + $0x12] sm:$0x1] %vm267_vm0, %v397_v46  ;;  %v404_v48 = vld [vmem:[%s403_s14] sm:$0x1]  ;;  %s1278_s20 = sadd.s32 2944, %s1696_s25 }
  0x5f   : > { %v513_v49 = vrot.slane %v491_v47, 1  ;;  %v533_v50 = vrot.slane %v491_v47, 2  ;;  %405 = vst.msk [vmem:[#allocation2 + $0x13] sm:$0x1] %vm267_vm0, %v404_v48  ;;  %s410_s23 = scalar_lea.vmem %s2158_s1, %s409_s17  ;;  %s429_s28 = sadd.s32 %s1278_s20, %s1691_s22  ;;  %v672_v46 = vld [vmem:[%s2161_s4 + $0x18] sm:$0xff] }
  0x60   : > { %v411_v51 = vld [vmem:[%s410_s23] sm:$0x1]  ;;  %s430_s24 = sld [smem:[#allocation4 + %s429_s28]]  ;;  %s1583_s25 = smov 64  }
  0x61   : > { %v514_v52 = vsel %vm511_vm1, %v512_v44, %v513_v49  ;;  %v534_v53 = vsel %vm531_vm2, %v532_v45, %v533_v50  ;;  %412 = vst.msk [vmem:[#allocation2 + $0x14] sm:$0x1] %vm267_vm0, %v411_v51  ;;  %s1584_s23 = smov 8   ;;  %v671_v45 = vld [vmem:[%s2161_s4 + $0x10] sm:$0xff]  ;;  %s1586_s26 = smov 24  }
  0x62   : > { %519 = vrot.lane.b32.xlu0 %v514_v52, %s1582_s0  ;;  %539 = vrot.lane.b32.xlu1 %v534_v53, %s1583_s25  ;;  %s417_s18 = scalar_lea.vmem %s2158_s1, %s416_s16  ;;  %s1590_s21 = smov 48  }
  0x63   : > { %v418_v54 = vld [vmem:[%s417_s18] sm:$0x1]  ;;  %s424_s29 = scalar_lea.vmem %s2158_s1, %s423_s27  ;;  %s1585_s18 = smov 16  }
  0x64   : > { %419 = vst.msk [vmem:[#allocation2 + $0x15] sm:$0x1] %vm267_vm0, %v418_v54  ;;  %v425_v57 = vld [vmem:[%s424_s29] sm:$0x1]  ;;  %s1295_s30 = sshll.u32 %s1662_s13, 8  ;;  %s1591_s13 = smov [#allocation5]  }
  0x65   : > { %426 = vst.msk [vmem:[#allocation2 + $0x16] sm:$0x1] %vm267_vm0, %v425_v57  ;;  %s2113_s29 = scalar_lea.hbm %s2165_s8, %s1295_s30  ;;  %s1519_s9 = sshll.u32 %s1591_s13, 4  ;;  %s1520_s9 = int_to_ptr.vmem [resolvable:$false] %s1519_s9 }
  0x66   : > { %s431_s10 = scalar_lea.vmem %s2158_s1, %s430_s24  ;;  %s1521_s14 = scalar_lea.vmem %s1520_s9, 512 }
  0x67   : > { %v432_v59 = vld [vmem:[%s431_s10] sm:$0x1] }
  0x68   : > { %433 = vst.msk [vmem:[#allocation2 + $0x17] sm:$0x1] %vm267_vm0, %v432_v59 }
  0x6f   : > { %v492_v60 = vld [vmem:[#allocation2 + $0x10] sm:$0xff] }
  0x70   : > { %v515_v61 = vrot.slane %v492_v60, 1  ;;  %v535_v62 = vrot.slane %v492_v60, 2 }
  0x72   : > { %v516_v63 = vsel %vm511_vm1, %v513_v49, %v515_v61  ;;  %v536_v0 = vsel %vm531_vm2, %v533_v50, %v535_v62  ;;  %v518_v2 = vsel %vm511_vm1, %v515_v61, %v517_v25  ;;  %v538_v3 = vsel %vm531_vm2, %v535_v62, %v537_v1 }
  0x73   : > { %521 = vrot.lane.b32.xlu0 %v516_v63, %s1582_s0  ;;  %541 = vrot.lane.b32.xlu1 %v536_v0, %s1583_s25 }
  0x77   : > { %523 = vrot.lane.b32.xlu0 %v518_v2, %s1582_s0  ;;  %545 = vrot.lane.b32.xlu1 %v537_v1, %s1583_s25 }
  0x7b   : > { %543 = vrot.lane.b32.xlu0 %v538_v3, %s1583_s25 }
  0xb4   : > { %v526_v4 = vpop.permute.xlu1 %525 }
  0xb5   : > { %v555_v17 = vsel %vm551_vm3, %v1796_v23, %v526_v4 }
  0xd4   : > { %v520_v5 = vpop.permute.xlu0 %519  ;;  %v540_v6 = vpop.permute.xlu1 %539 }
  0xd5   : > { %v552_v7 = vsel %vm551_vm3, %v1890_v42, %v520_v5 }
  0xd6   : > { %v557_v8 = vsel %vm556_vm4, %v552_v7, %v540_v6 }
  0xd7   : > { %1357 = vmatprep.mubr.msk.f32.mxu0 %vm567_vm5, %v557_v8 }
  0xe5   : > { %v522_v9 = vpop.permute.xlu0 %521  ;;  %v542_v10 = vpop.permute.xlu1 %541 }
  0xe6   : > { %v553_v11 = vsel %vm551_vm3, %v491_v47, %v522_v9  ;;  %v1434_v47 = vpack.c.bf16 %v672_v46, %v671_v45 }
  0xe7   : > { %v558_v12 = vsel %vm556_vm4, %v553_v11, %v542_v10 }
  0xe8   : > { %1358 = vmatmul.mubr.msk.f32.vlgmr.msra.gmra.mrb[0].mxu0 %vm567_vm5, %v558_v12  ;;  %1435 = vmatprep.subr.bf16.mxu1 %v1434_v47 }
  0xe9   : > { %v524_v13 = vpop.permute.xlu0 %523  ;;  %v546_v14 = vpop.permute.xlu1 %545  ;;  %1437 = vmatpush3.bf16.msra.mxu1 %v1434_v47 }
  0xea   : > { %v554_v15 = vsel %vm551_vm3, %v492_v60, %v524_v13  ;;  %v560_v19 = vsel %vm556_vm4, %v555_v17, %v546_v14 }
  0xed   : > { %v544_v16 = vpop.permute.xlu0 %543 }
  0xee   : > { %v559_v18 = vsel %vm556_vm4, %v554_v15, %v544_v16 }
  0xef   : > { %1360 = vmatprep.mubr.msk.f32.mxu0 %vm567_vm5, %v559_v18 }
  0xf0   : > { %1361 = vmatmul.mubr.msk.f32.gmra.mrb[2].mxu0 %vm567_vm5, %v560_v19 }
 0x1bb   : > { %v1359_v21 = vpop.f32.mrb[0].mxu0 }
 0x1bc   : > { %v652_v22 = vadd.f32 %v1359_v21, %v1214_v20  ;;  %v646_v24 = vpop.f32.mrb[1].mxu0  ;;  %v859_v21 = vld [vmem:[%s2163_s6 + $0x8] sm:$0xff] }
 0x1bd   : > { %v647_v25 = vadd.f32 %v1214_v20, %v646_v24  ;;  %v1587_v24 = vmov 0.0|0.0  }
 0x1be   : > { %v1965_v26 = vmax.f32 %v652_v22, 0.0  ;;  %v860_v22 = vld [vmem:[%s2163_s6 + $0x10] sm:$0xff]  ;;  %1438 = vmatprep.subr.bf16.mxu1 %v1587_v24 }
 0x1bf   : > { %v665_v27 = vmax.f32 %v647_v25, 0.0 }
 0x1c0   : > { %v679_v23 = vrot.slane %v1965_v26, 1  ;;  %v698_v32 = vrot.slane %v1965_v26, 2  ;;  %v718_v43 = vrot.slane %v1965_v26, 3 }
 0x1c1   : > { %v678_v28 = vrot.slane %v665_v27, 1  ;;  %v697_v31 = vrot.slane %v665_v27, 2  ;;  %v717_v42 = vrot.slane %v665_v27, 3 }
 0x1c3   : > { %v1362_v29 = vpop.f32.mrb[2].mxu0  ;;  %v680_v30 = vsel %vm511_vm1, %v678_v28, %v679_v23  ;;  %v699_v41 = vsel %vm531_vm2, %v697_v31, %v698_v32  ;;  %v719_v48 = vsel %vm716_vm6, %v717_v42, %v718_v43  ;;  %v863_v28 = vld [vmem:[%s2163_s6 + $0x28] sm:$0xff]  ;;  %v865_v31 = vld [vmem:[%s2163_s6 + $0x38] sm:$0xff] }
 0x1c4   : > { %v662_v33 = vadd.f32 %v1362_v29, %v1214_v20  ;;  %v656_v34 = vpop.f32.mrb[3].mxu0  ;;  %685 = vrot.lane.b32.xlu0 %v680_v30, %s1584_s23  ;;  %v864_v30 = vld [vmem:[%s2163_s6 + $0x30] sm:$0xff] }
 0x1c5   : > { %v657_v37 = vadd.f32 %v1214_v20, %v656_v34  ;;  %v858_v20 = vld [vmem:[%s2163_s6] sm:$0xff]  ;;  %v867_v34 = vld [vmem:[%s2163_s6 + $0x48] sm:$0xff] }
 0x1c6   : > { %v1977_v39 = vmax.f32 %v662_v33, 0.0  ;;  %v1439_v25 = vpack.c.bf16 %v859_v21, %v858_v20  ;;  %v866_v33 = vld [vmem:[%s2163_s6 + $0x40] sm:$0xff] }
 0x1c7   : > { %v667_v40 = vmax.f32 %v657_v37, 0.0  ;;  %v1451_v35 = vpack.c.bf16 %v867_v34, %v866_v33 }
 0x1c8   : > { %704 = vrot.lane.b32.xlu0 %v699_v41, %s1585_s18  ;;  %v683_v44 = vrot.slane %v1977_v39, 1  ;;  %v702_v50 = vrot.slane %v1977_v39, 2  ;;  %v722_v56 = vrot.slane %v1977_v39, 3  ;;  %v1589_v41 = vmov 0.0  }
 0x1c9   : > { %v681_v49 = vrot.slane %v667_v40, 1  ;;  %v700_v52 = vrot.slane %v667_v40, 2  ;;  %v720_v55 = vrot.slane %v667_v40, 3 }
 0x1ca   : > { %691 = vrot.lane.b32.xlu1 %v683_v44, %s1584_s23 }
 0x1cb   : > { %v684_v51 = vsel %vm511_vm1, %v681_v49, %v683_v44  ;;  %v682_v53 = vsel %vm511_vm1, %v679_v23, %v681_v49  ;;  %v703_v54 = vsel %vm531_vm2, %v700_v52, %v702_v50  ;;  %v701_v57 = vsel %vm531_vm2, %v698_v32, %v700_v52  ;;  %v862_v23 = vld [vmem:[%s2163_s6 + $0x20] sm:$0xff] }
 0x1cc   : > { %724 = vrot.lane.b32.xlu0 %v719_v48, %s1586_s26  ;;  %v723_v58 = vsel %vm716_vm6, %v720_v55, %v722_v56  ;;  %v721_v59 = vsel %vm716_vm6, %v718_v43, %v720_v55  ;;  %v1445_v29 = vpack.c.bf16 %v863_v28, %v862_v23  ;;  %v1448_v32 = vpack.c.bf16 %v865_v31, %v864_v30 }
 0x1ce   : > { %710 = vrot.lane.b32.xlu1 %v702_v50, %s1585_s18 }
 0x1d0   : > { %689 = vrot.lane.b32.xlu0 %v684_v51, %s1584_s23 }
 0x1d2   : > { %687 = vrot.lane.b32.xlu1 %v682_v53, %s1584_s23 }
 0x1d4   : > { %708 = vrot.lane.b32.xlu0 %v703_v54, %s1585_s18 }
 0x1d6   : > { %706 = vrot.lane.b32.xlu1 %v701_v57, %s1585_s18 }
 0x1d8   : > { %728 = vrot.lane.b32.xlu0 %v723_v58, %s1586_s26 }
 0x1da   : > { %726 = vrot.lane.b32.xlu1 %v721_v59, %s1586_s26 }
 0x1de   : > { %730 = vrot.lane.b32.xlu1 %v722_v56, %s1586_s26 }
 0x236   : > { %v686_v60 = vpop.permute.xlu0 %685 }
 0x237   : > { %v737_v63 = vsel %vm736_vm7, %v665_v27, %v686_v60 }
 0x23a   : > { %v705_v61 = vpop.permute.xlu0 %704 }
 0x23b   : > { %v742_v0 = vsel %vm741_vm8, %v737_v63, %v705_v61 }
 0x23c   : > { %v692_v62 = vpop.permute.xlu1 %691 }
 0x23d   : > { %v740_v16 = vsel %vm736_vm7, %v1977_v39, %v692_v62 }
 0x23e   : > { %v725_v1 = vpop.permute.xlu0 %724 }
 0x23f   : > { %v747_v2 = vsel %vm746_vm9, %v742_v0, %v725_v1 }
 0x240   : > { %v711_v3 = vpop.permute.xlu1 %710  ;;  %1371 = vmatprep.mubr.msk.f32.mxu1 %vm551_vm3, %v747_v2 }
 0x241   : > { %v745_v17 = vsel %vm741_vm8, %v740_v16, %v711_v3 }
 0x242   : > { %v690_v4 = vpop.permute.xlu0 %689 }
 0x243   : > { %v739_v8 = vsel %vm736_vm7, %v667_v40, %v690_v4 }
 0x244   : > { %v688_v5 = vpop.permute.xlu1 %687 }
 0x245   : > { %v738_v10 = vsel %vm736_vm7, %v1965_v26, %v688_v5  ;;  %v861_v26 = vld [vmem:[%s2163_s6 + $0x18] sm:$0xff] }
 0x246   : > { %v709_v6 = vpop.permute.xlu0 %708  ;;  %v1442_v27 = vpack.c.bf16 %v861_v26, %v860_v22 }
 0x247   : > { %v744_v11 = vsel %vm741_vm8, %v739_v8, %v709_v6 }
 0x248   : > { %v707_v7 = vpop.permute.xlu1 %706 }
 0x249   : > { %v743_v12 = vsel %vm741_vm8, %v738_v10, %v707_v7 }
 0x24a   : > { %v729_v9 = vpop.permute.xlu0 %728 }
 0x24b   : > { %v749_v14 = vsel %vm746_vm9, %v744_v11, %v729_v9 }
 0x24c   : > { %v727_v13 = vpop.permute.xlu1 %726 }
 0x24d   : > { %v748_v15 = vsel %vm746_vm9, %v743_v12, %v727_v13 }
 0x24e   : > { %1372 = vmatmul.mubr.msk.f32.vlgmr.msra.gmra.mrb[0].mxu1 %vm551_vm3, %v748_v15 }
 0x24f   : > { %1374 = vmatprep.mubr.msk.f32.mxu1 %vm551_vm3, %v749_v14  ;;  %1440 = vmatpush3.bf16.msra.mxu1 %v1439_v25 }
 0x250   : > { %v731_v18 = vpop.permute.xlu1 %730  ;;  %1441 = vmatprep.subr.bf16.mxu1 %v1587_v24 }
 0x251   : > { %v750_v19 = vsel %vm746_vm9, %v745_v17, %v731_v18 }
 0x252   : > { %1375 = vmatmul.mubr.msk.f32.gmra.mrb[2].mxu1 %vm551_vm3, %v750_v19 }
 0x253   : > { %1443 = vmatpush3.bf16.msra.mxu1 %v1442_v27  ;;  %1397 = vmatprep.mubr.msk.f32.mxu1 %vm1588_vm10, %v1589_v41 }
 0x254   : > { %1444 = vmatprep.subr.bf16.mxu1 %v1587_v24 }
 0x257   : > { %1446 = vmatpush3.bf16.msra.mxu1 %v1445_v29 }
 0x258   : > { %1447 = vmatprep.subr.bf16.mxu1 %v1587_v24 }
 0x25b   : > { %1449 = vmatpush3.bf16.msra.mxu1 %v1448_v32 }
 0x25c   : > { %1450 = vmatprep.subr.bf16.mxu1 %v1587_v24 }
 0x25f   : > { %1452 = vmatpush3.bf16.msra.mxu1 %v1451_v35 }
 0x321   : > { %v1373_v37 = vpop.f32.mrb[0].mxu1 }
 0x322   : > { %v841_v38 = vadd.f32 %v1373_v37, %v1219_v36  ;;  %v835_v39 = vpop.f32.mrb[1].mxu1 }
 0x323   : > { %v836_v40 = vadd.f32 %v1219_v36, %v835_v39 }
 0x324   : > { %v2057_v42 = vmax.f32 %v841_v38, 0.0 }
 0x325   : > { %v854_v43 = vmax.f32 %v836_v40, 0.0  ;;  %v1376_v44 = vpop.f32.mrb[2].mxu1 }
 0x326   : > { %v845_v45 = vpop.f32.mrb[3].mxu1  ;;  %v888_v46 = vrot.slane %v2057_v42, 2  ;;  %v873_v47 = vrot.slane %v2057_v42, 1  ;;  %v921_v52 = vrot.slane %v2057_v42, 4  ;;  %v904_v57 = vrot.slane %v2057_v42, 3 }
 0x327   : > { %v846_v48 = vadd.f32 %v1219_v36, %v845_v45  ;;  %v887_v49 = vrot.slane %v854_v43, 2  ;;  %v872_v50 = vrot.slane %v854_v43, 1  ;;  %v920_v51 = vrot.slane %v854_v43, 4 }
 0x328   : > { %v903_v53 = vrot.slane %v854_v43, 3  ;;  %v851_v58 = vadd.f32 %v1376_v44, %v1219_v36  ;;  %v1224_v36 = vld [vmem:[%s2164_s7] ss:$0 sm:$0xff] }
 0x329   : > { %v856_v54 = vmax.f32 %v846_v48, 0.0  ;;  %v889_v55 = vsel %vm531_vm2, %v887_v49, %v888_v46  ;;  %v874_v56 = vsel %vm511_vm1, %v872_v50, %v873_v47  ;;  %v922_v59 = vsel %vm919_vm11, %v920_v51, %v921_v52 }
 0x32a   : > { %894 = vrot.lane.b32.xlu1 %v889_v55, %s1582_s0  ;;  %877 = vrot.lane.b32.xlu0 %v874_v56, %s1585_s18  ;;  %v905_v60 = vsel %vm716_vm6, %v903_v53, %v904_v57  ;;  %v857_v63 = vmax.f32 %v851_v58, 0.0 }
 0x32b   : > { %v890_v61 = vrot.slane %v856_v54, 2  ;;  %v875_v62 = vrot.slane %v856_v54, 1  ;;  %v923_v1 = vrot.slane %v856_v54, 4  ;;  %v906_v5 = vrot.slane %v856_v54, 3 }
 0x32c   : > { %v892_v2 = vrot.slane %v857_v63, 2  ;;  %v908_v6 = vrot.slane %v857_v63, 3  ;;  %v925_v7 = vrot.slane %v857_v63, 4 }
 0x32d   : > { %v891_v0 = vsel %vm531_vm2, %v888_v46, %v890_v61  ;;  %v924_v3 = vsel %vm919_vm11, %v921_v52, %v923_v1  ;;  %v876_v4 = vsel %vm511_vm1, %v873_v47, %v875_v62  ;;  %v907_v9 = vsel %vm716_vm6, %v904_v57, %v906_v5 }
 0x32e   : > { %927 = vrot.lane.b32.xlu1 %v922_v59, %s1583_s25  ;;  %910 = vrot.lane.b32.xlu0 %v905_v60, %s1590_s21  ;;  %v893_v8 = vsel %vm531_vm2, %v890_v61, %v892_v2  ;;  %v926_v10 = vsel %vm919_vm11, %v923_v1, %v925_v7  ;;  %v909_v11 = vsel %vm716_vm6, %v906_v5, %v908_v6 }
 0x332   : > { %896 = vrot.lane.b32.xlu1 %v891_v0, %s1582_s0  ;;  %881 = vrot.lane.b32.xlu0 %v875_v62, %s1585_s18 }
 0x336   : > { %929 = vrot.lane.b32.xlu1 %v924_v3, %s1583_s25  ;;  %879 = vrot.lane.b32.xlu0 %v876_v4, %s1585_s18  ;;  %s261_s18 = sand.u32 1, %s1571_s11  }
 0x337   : > { %s1182_s28 = sshll.u32 %s261_s18, 4  ;;  %s2115_s12 = scalar_lea.sflag [#allocation6], %s261_s18 }
 0x338   : > { %s263_s24 = scalar_lea.vmem [#allocation5], %s1182_s28 }
 0x339   : > { %s1097_s15 = sshll.u32 %s263_s24, 4  ;;  %s2108_s15 = int_to_ptr.vmem [resolvable:$true] %s1097_s15 }
 0x33a   : > { %898 = vrot.lane.b32.xlu1 %v893_v8, %s1582_s0  ;;  %912 = vrot.lane.b32.xlu0 %v907_v9, %s1590_s21  ;;  %s1515_s26 = scalar_lea.vmem %s2108_s15, 256  ;;  %p1522_p4 = scmp.lt.s32.totalorder %s2108_s15, %s1520_s9 }
 0x33b   : > { %p1516_p1 = scmp.ne.s32.totalorder %s2108_s15, %s1515_s26  ;;  %p1523_p5 = scmp.lt.s32.totalorder %s1521_s14, %s1515_s26 }
 0x33d   : > { %p1517_p2 = pnand %p1516_p1, %p1679_p10  ;;  %p1524_p6 = por %p1523_p5, %p1522_p4 }
 0x33e   : > { %931 = vrot.lane.b32.xlu1 %v926_v10, %s1583_s25  ;;  %914 = vrot.lane.b32.xlu0 %v909_v11, %s1590_s21 }
 0x33f   : > { %p1518_p3 = pneg %p1517_p2 }
 0x341   : > { %p1525_p7 = pnand %p1524_p6, %p1518_p3 }
 0x39c   : > { %v895_v12 = vpop.permute.xlu1 %894  ;;  %v878_v13 = vpop.permute.xlu0 %877 }
 0x39d   : > { %v936_v14 = vsel %vm741_vm8, %v854_v43, %v878_v13 }
 0x39e   : > { %v939_v16 = vsel %vm551_vm3, %v936_v14, %v895_v12 }
 0x3a0   : > { %v928_v15 = vpop.permute.xlu1 %927  ;;  %v911_v17 = vpop.permute.xlu0 %910 }
 0x3a1   : > { %v943_v18 = vsel %vm942_vm12, %v939_v16, %v911_v17 }
 0x3a2   : > { %v946_v19 = vsel %vm556_vm4, %v943_v18, %v928_v15 }
 0x3a3   : > { %1398 = vmatmul.mubr.msk.f32.vlgmr.msra.gmra.mrb[4].mxu1 %vm955_vm13, %v946_v19 }
 0x3a4   : > { %v897_v20 = vpop.permute.xlu1 %896  ;;  %v882_v21 = vpop.permute.xlu0 %881  ;;  %1400 = vmatprep.mubr.msk.f32.mxu1 %vm1588_vm10, %v1589_v41 }
 0x3a5   : > { %v938_v30 = vsel %vm741_vm8, %v856_v54, %v882_v21 }
 0x3a8   : > { %v930_v22 = vpop.permute.xlu1 %929  ;;  %v880_v24 = vpop.permute.xlu0 %879 }
 0x3a9   : > { %v937_v25 = vsel %vm741_vm8, %v2057_v42, %v880_v24 }
 0x3aa   : > { %v940_v27 = vsel %vm551_vm3, %v937_v25, %v897_v20 }
 0x3ac   : > { %v899_v26 = vpop.permute.xlu1 %898  ;;  %v913_v23 = vpop.permute.xlu0 %912 }
 0x3ad   : > { %v944_v28 = vsel %vm942_vm12, %v940_v27, %v913_v23  ;;  %v941_v31 = vsel %vm551_vm3, %v938_v30, %v899_v26 }
 0x3ae   : > { %v947_v29 = vsel %vm556_vm4, %v944_v28, %v930_v22 }
 0x3af   : > { %1401 = vmatmul.mubr.msk.f32.gmra.mrb[6].mxu1 %vm955_vm13, %v947_v29 }
 0x3b0   : > { %v932_v32 = vpop.permute.xlu1 %931  ;;  %v915_v33 = vpop.permute.xlu0 %914  ;;  %1403 = vmatprep.mubr.msk.f32.mxu1 %vm1588_vm10, %v1589_v41 }
 0x3b1   : > { %v945_v34 = vsel %vm942_vm12, %v941_v31, %v915_v33 }
 0x3b2   : > { %v948_v35 = vsel %vm556_vm4, %v945_v34, %v932_v32 }
 0x3b3   : > { %1404 = vmatmul.mubr.msk.f32.gmra.mrb[8].mxu1 %vm955_vm13, %v948_v35 }
 0x476   : > { %v1031_v37 = vpop.f32.mrb[4].mxu1 }
 0x477   : > { %v1032_v38 = vadd.f32 %v1224_v36, %v1031_v37  ;;  %v1399_v39 = vpop.f32.mrb[5].mxu1 }
 0x479   : > { %v1045_v40 = vmax.f32 %v1032_v38, 0.0 }
 0x47b   : > { %1048 = vxpose.xlu0.b32.start [1/3] (short) (narrow) %v1045_v40, 16 }
 0x482   : > { %v1036_v42 = vpop.f32.mrb[6].mxu1 }
 0x483   : > { %v1037_v43 = vadd.f32 %v1224_v36, %v1036_v42  ;;  %v1402_v41 = vpop.f32.mrb[7].mxu1 }
 0x485   : > { %v1046_v44 = vmax.f32 %v1037_v43, 0.0 }
 0x486   : > { %v1041_v45 = vpop.f32.mrb[8].mxu1 }
 0x487   : > { %v1042_v46 = vadd.f32 %v1224_v36, %v1041_v45  ;;  %1049 = vxpose.xlu0.b32.cont [2/3] (short) (narrow) %v1046_v44, 16  ;;  %v1405_v47 = vpop.f32.mrb[9].mxu1 }
 0x489   : > { %v1047_v48 = vmax.f32 %v1042_v46, 0.0 }
 0x48b   : > { %1050 = vxpose.xlu0.b32.end [3/3] (short) (narrow) %v1047_v48, 16 }
 0x503   : > { %v1064_v49 = vpop.trf.xlu0 }
 0x504   : > { %1081 = vst.msk [vmem:[%s263_s24] sm:$0xff] %vm1080_vm14, %v1064_v49 }
 0x507   : > { %v1065_v50 = vpop.trf.xlu0 }
 0x508   : > { %1082 = vst.msk [vmem:[%s263_s24 + $0x8] sm:$0xff] %vm1080_vm14, %v1065_v50 }
 0x509   : > { %1528 = shalt.err (!%p1525_p7)
}
 0x50a   : > { %s1529_s16 = scalar_lea.hbm %s2113_s29, 256  ;;  %s1533_s27 = scalar_lea.hbm %s2165_s8, 512 }
 0x50b   : > { %p1530_p8 = scmp.ne.s32.totalorder %s2113_s29, %s1529_s16  ;;  %p1534_p13 = scmp.lt.u32.totalorder %s2113_s29, %s2165_s8 }
 0x50c   : > { %p1535_p0 = scmp.lt.u32.totalorder %s1533_s27, %s1529_s16  ;;  %p1537_p2 = scmp.lt.u32.totalorder %s1529_s16, %s2113_s29 }
 0x50d   : > { %p1531_p9 = pnand %p1530_p8, %p1679_p10 }
 0x50e   : > { %p1536_p1 = por %p1535_p0, %p1534_p13 }
 0x50f   : > { %p1532_p12 = pneg %p1531_p9 }
 0x510   : > { %p1538_p3 = por %p1537_p2, %p1536_p1 }
 0x512   : > { %p1539_p4 = pnand %p1538_p3, %p1532_p12 }
 0x514   : > { %1542 = shalt.err (!%p1539_p4)
}
 0x515   : > { %s1592_s25 = smov 128  }
 0x516   : > { %1453 = dma.vmem_to_hbm [thread:$0]  (%p1679_p10), %s2108_s15, 256, %s2113_s29, %s2115_s12, %s1592_s25, %s1592_s25, %s1584_s23  }
 0x517 PF: > { %s2180_s18 = sld [smem:[#allocation11_spill]]  ;;  %s2181_s28 = sld [smem:[#allocation9_spill]] }
 0x51d   : > { %p1459_p5 = scmp.ge.s32.totalorder %s2180_s18, 2  ;;  %s1112_s30 = sand.u32 1, %s2181_s28  }
 0x51e   : > { %s1113_s17 = scalar_lea.sflag [#allocation6], %s1112_s30 }
 0x51f   : > { %p1456_p6 = pnand %p1459_p5, %p1683_p11 }
 0x521   : > { %1562 = dma.done.wait (!%p1456_p6), %s1113_s17, 256  }
 0x522   : > { %1564 = vsyncadd (!%p1456_p6), %s1113_s17, 4294967040  ;;  %s2183_s12 = sld [smem:[#allocation12_spill]]  ;;  %s2184_s22 = sld [smem:[#allocation10_spill]] }
 0x523   : > { %s2185_s0 = sld [smem:[#allocation13_spill]]  ;;  %s2186_s10 = smov %s1571_s11 }
 0x528   : > { %p24_p7 = scmp.ge.s32.totalorder %s2183_s12, 4   ;;  %s2187_s11 = smov %s2184_s22 }
 0x52a   :  { %26 = sbr.rel (!%p24_p7) target bundleno = 18 (0x12), region = 112 }
 0x531   :  { %1118 = vsyncpa [#allocation6], 1 }
 0x532   :  { %1120 = vsyncpa [#allocation6 + $0x1], 1 }

</bundles_post_ra>
